<compile_context>
chip_gen: v5e
topology: v5e:2x2
jax: 0.10.0
libtpu: 0.0.40
codegen_flags: <defaults>
</compile_context>

<pallas_src>
import functools

import jax
import jax.numpy as jnp
from jax import lax
from jax.experimental import pallas as pl
from jax.experimental.pallas import tpu as pltpu


# ----------------------------------------------------------------------------
# Pallas kernel: fused 3-layer decoder on one batch tile.
# Refs: x, (W1, A1), (W2, A2), (W3, A3), out    where A = [2, N] (scale row, shift row).
# ----------------------------------------------------------------------------
def _decoder_kernel(x_ref, w1_ref, a1_ref, w2_ref, a2_ref, w3_ref, a3_ref, out_ref):
    def affine_matmul(x, w_ref, a_ref):
        # f32 weights -> f32 MXU path (tight check); bf16/int8 weights -> bf16 MXU path.
        cd = jnp.float32 if w_ref.dtype == jnp.float32 else jnp.bfloat16
        r = jnp.dot(x.astype(cd), w_ref[...].astype(cd),
                    preferred_element_type=jnp.float32)
        # Per-column affine: dequant scale (int8 path, else 1.0) and folded conv-bias/BN shift.
        return r * a_ref[0:1, :] + a_ref[1:2, :]

    h = jnp.maximum(affine_matmul(x_ref[...], w1_ref, a1_ref), 0.0)   # block 1 (+ReLU)
    h = jnp.maximum(affine_matmul(h, w2_ref, a2_ref), 0.0)            # block 2 (+ReLU)
    # Block 3 (BN, no ReLU). Columns are only the first `seq_len` positions, so the
    # x[:, :, :sequence_len] slice is free.
    out_ref[...] = affine_matmul(h, w3_ref, a3_ref).astype(out_ref.dtype)


# ----------------------------------------------------------------------------
# Host-side (one-time) parameter folding.
# ----------------------------------------------------------------------------
def _round_up(n, m):
    return ((n + m - 1) // m) * m


def _conv_transpose_matrix(w, l_in, stride, padding, l_out):
    """Dense matrix M with M[(ci, i), (co, t)] = w[ci, co, k], k = t - i*stride + padding.

    w: [C_in, C_out, K] (PyTorch ConvTranspose1d layout). Rows ordered (ci, i), cols (co, t).
    """
    c_in, c_out, k_size = w.shape
    i = jnp.arange(l_in)[:, None]
    t = jnp.arange(l_out)[None, :]
    k = t - stride * i + padding
    valid = (k >= 0) & (k < k_size)
    k_c = jnp.clip(k, 0, k_size - 1)
    g = jnp.take(w, k_c.reshape(-1), axis=2).reshape(c_in, c_out, l_in, l_out)
    g = jnp.where(valid[None, None, :, :], g, 0.0)
    return jnp.transpose(g, (0, 2, 1, 3)).reshape(c_in * l_in, c_out * l_out)


def _fold_bn(mat, conv_bias, gamma, beta, mean, var, eps, l_out):
    """Fold conv bias + inference BatchNorm (per out-channel affine) into (mat, column shift)."""
    scale = gamma / jnp.sqrt(var + eps)
    shift = beta - mean * scale
    s_col = jnp.repeat(scale, l_out)
    c_col = jnp.repeat(conv_bias * scale + shift, l_out)
    return mat * s_col[None, :], c_col[None, :]


def _pad_cols(mat, shift, target):
    pad = target - mat.shape[1]
    if pad:
        mat = jnp.pad(mat, ((0, 0), (0, pad)))
        shift = jnp.pad(shift, ((0, 0), (0, pad)))
    return mat, shift


def _pad_rows(mat, target):
    pad = target - mat.shape[0]
    if pad:
        mat = jnp.pad(mat, ((0, pad), (0, 0)))
    return mat


def _quantize_layer(mat, shift, weight_dtype):
    """Return (stored weight, [2, N] f32 affine = (dequant scale row, shift row))."""
    n = mat.shape[1]
    shift = shift.reshape(-1).astype(jnp.float32)
    if weight_dtype == jnp.int8:
        # Per-column symmetric int8; dequant scale folded into the post-matmul affine.
        absmax = jnp.max(jnp.abs(mat), axis=0)
        scale = jnp.maximum(absmax, 1e-30) / 127.0
        wq = jnp.clip(jnp.round(mat / scale[None, :]), -127, 127).astype(jnp.int8)
        return wq, jnp.stack([scale.astype(jnp.float32), shift])
    # TODO(synk): on v7x prefer fp8 (e4m3) storage (its MXU has no int path); int8 here is
    # dequantized to bf16 on the VPU so it is valid on all generations.
    return mat.astype(weight_dtype), jnp.stack([jnp.ones((n,), jnp.float32), shift])


def fold_decoder_params(params, configs, weight_dtype=jnp.bfloat16, eps=1e-5):
    """Precompute the matmul-form weights for the fused decoder kernel (call once)."""
    seq_len = configs["sequence_len"]
    # Static temporal extents: (L-1)*stride - 2*pad + k + out_pad  =>  1 -> 7 -> 19 -> 18+S
    L0, L1, L2 = 1, 7, 19

    m1 = _conv_transpose_matrix(params["w1"], L0, 2, 1, L1)        # [F,        2*mid*7 ]
    m2 = _conv_transpose_matrix(params["w2"], L1, 2, 1, L2)        # [2*mid*7,  mid*19  ]
    m3 = _conv_transpose_matrix(params["w3"], L2, 1, 0, seq_len)   # [mid*19,   C_in*S  ]
    # (block 3: only the first S output columns are built; BN3 is per-channel, so
    #  slice-then-BN == BN-then-slice in inference mode.)

    w1, c1 = _fold_bn(m1, params["b1"], *params["bn1"], eps, L1)
    w2, c2 = _fold_bn(m2, params["b2"], *params["bn2"], eps, L2)
    w3, c3 = _fold_bn(m3, params["b3"], *params["bn3"], eps, seq_len)

    # Lane-dense hidden dims: pad 2*mid*7 (448->512) and mid*19 (608->640) to multiples of
    # 128 so h1/h2 fill whole vregs (no masked vst/vld or partial MXU column passes).
    # Exact: padded cols get shift 0, relu(0)=0, and the matching padded rows of the next
    # matrix are 0, so they contribute nothing.
    k1 = _round_up(w1.shape[1], 128)
    k2 = _round_up(w2.shape[1], 128)
    w1, c1 = _pad_cols(w1, c1, k1)
    w2 = _pad_rows(w2, k1)
    w2, c2 = _pad_cols(w2, c2, k2)
    w3 = _pad_rows(w3, k2)

    q1, a1 = _quantize_layer(w1, c1, weight_dtype)
    q2, a2 = _quantize_layer(w2, c2, weight_dtype)
    q3, a3 = _quantize_layer(w3, c3, weight_dtype)
    return dict(w1=q1, w2=q2, w3=q3, a1=a1, a2=a2, a3=a3)


# ----------------------------------------------------------------------------
# Forward wrapper.
# ----------------------------------------------------------------------------
@functools.partial(jax.jit, static_argnames=("sequence_len", "input_channels", "tile_b",
                                             "single_buffer_weights"))
def cnn_decoder_forward(x_in, folded, *, sequence_len, input_channels, tile_b=None,
                        single_buffer_weights=False):
    B, F = x_in.shape
    n_out = input_channels * sequence_len
    w1, w2, w3 = folded["w1"], folded["w2"], folded["w3"]
    a1, a2, a3 = folded["a1"], folded["a2"], folded["a3"]
    assert w1.shape[0] == F and w3.shape[1] == n_out

    if tile_b is None:
        # Do NOT split small batches: one full-batch step is strictly faster on single-TC
        # v5e/v6e, and a 2-way "parallel" split only pays on v7x once each TensorCore gets
        # >=256 rows (full MXU M-passes) to amortize its own copy of the weight stream.
        tile_b = B // 2 if (B >= 512 and (B // 2) % 256 == 0) else B
    assert B % tile_b == 0, "batch must be divisible by the batch tile"
    # Sublane packing: f32 -> 8 rows/vreg, bf16 -> 16, 8-bit -> 32.
    pack = 8 * max(1, 4 // jnp.dtype(x_in.dtype).itemsize)
    assert tile_b == B or tile_b % pack == 0, (
        f"tiled batch blocks must be a multiple of {pack} rows for dtype {x_in.dtype}")

    grid_steps = B // tile_b

    def resident_block(a):
        # Whole-array block with a constant index map: DMA'd once, stays resident in VMEM.
        # When the grid has >1 step, optionally request single buffering so resident weights
        # are not double-buffered (halves their VMEM footprint).
        if single_buffer_weights and grid_steps > 1:
            return pl.BlockSpec(a.shape, lambda i: (0, 0), pipeline_mode=pl.Buffered(1))
        return pl.BlockSpec(a.shape, lambda i: (0, 0))

    # Advisory cost estimate so XLA can overlap this small custom call with its neighbours.
    w_bytes = sum(int(w.size) * w.dtype.itemsize for w in (w1, w2, w3))
    a_bytes = sum(int(a.size) * a.dtype.itemsize for a in (a1, a2, a3))
    io_bytes = (int(x_in.size) + B * n_out) * jnp.dtype(x_in.dtype).itemsize
    flops = 2 * B * (w1.shape[0] * w1.shape[1] + w2.shape[0] * w2.shape[1]
                     + w3.shape[0] * w3.shape[1])
    cost = pl.CostEstimate(flops=flops, transcendentals=0,
                           bytes_accessed=w_bytes + a_bytes + io_bytes)

    # TODO(synk): once input_channels*sequence_len grows enough that the resident W3 block
    # (plus double-buffering) approaches the VMEM limit (64 MiB physical on v7x), add a second
    # grid axis tiling W3's output columns and the out_specs N dim.

    out2d = pl.pallas_call(
        _decoder_kernel,
        out_shape=jax.ShapeDtypeStruct((B, n_out), x_in.dtype),
        grid_spec=pltpu.PrefetchScalarGridSpec(
            num_scalar_prefetch=0,
            grid=(grid_steps,),
            in_specs=[
                pl.BlockSpec((tile_b, F), lambda i: (i, 0)),   # batch tile of the input
                resident_block(w1), resident_block(a1),
                resident_block(w2), resident_block(a2),
                resident_block(w3), resident_block(a3),
            ],
            out_specs=pl.BlockSpec((tile_b, n_out), lambda i: (i, 0)),  # lane-dense store
        ),
        compiler_params=pltpu.CompilerParams(dimension_semantics=("parallel",)),
        cost_estimate=cost,
    )(x_in, w1, a1, w2, a2, w3, a3)

    out = out2d.reshape(B, input_channels, sequence_len)
    if sequence_len == 1:  # torch .squeeze(-1)
        out = out.reshape(B, input_channels)
    return out


# ----------------------------------------------------------------------------
# Pure-JAX reference (explicit ConvTranspose1d + inference BatchNorm), independent of the
# kernel-side matrix construction.
# ----------------------------------------------------------------------------
def _conv_transpose1d_ref(x, w, b, stride, padding, output_padding):
    batch, c_in, l_in = x.shape
    _, c_out, k_size = w.shape
    l_out = (l_in - 1) * stride - 2 * padding + k_size + output_padding
    full_len = (l_in - 1) * stride + k_size
    full = jnp.zeros((batch, c_out, full_len), jnp.float32)
    for i in range(l_in):
        contrib = jnp.einsum("bc,cok->bok", x[:, :, i], w,
                             precision=lax.Precision.HIGHEST)
        full = full.at[:, :, i * stride:i * stride + k_size].add(contrib)
    out = full[:, :, padding:padding + l_out]
    if out.shape[-1] < l_out:
        out = jnp.pad(out, ((0, 0), (0, 0), (0, l_out - out.shape[-1])))
    return out + b[None, :, None]


def _bn1d_ref(x, gamma, beta, mean, var, eps=1e-5):
    inv = gamma / jnp.sqrt(var + eps)
    return (x - mean[None, :, None]) * inv[None, :, None] + beta[None, :, None]


def cnn_decoder_ref(x_in, params, sequence_len):
    x = x_in[:, :, None]
    x = _conv_transpose1d_ref(x, params["w1"], params["b1"], 2, 1, 1)
    x = jnp.maximum(_bn1d_ref(x, *params["bn1"]), 0.0)
    x = _conv_transpose1d_ref(x, params["w2"], params["b2"], 2, 1, 1)
    x = jnp.maximum(_bn1d_ref(x, *params["bn2"]), 0.0)
    x = _conv_transpose1d_ref(x, params["w3"], params["b3"], 1, 0, 0)
    x = _bn1d_ref(x, *params["bn3"])
    return x[:, :, :sequence_len]


if __name__ == "__main__":
    # Small, module-consistent config (time-series decoder).
    B = 16
    configs = dict(final_out_channels=128, mid_channels=32,
                   input_channels=4, sequence_len=128)
    F = configs["final_out_channels"]
    ch1 = configs["mid_channels"] * 2
    ch2 = configs["mid_channels"]
    ch3 = configs["input_channels"]
    S = configs["sequence_len"]

    key = jax.random.PRNGKey(0)
    ks = jax.random.split(key, 16)

    def randn(k, shape, scale=1.0):
        return scale * jax.random.normal(k, shape, dtype=jnp.float32)

    params = dict(
        # ConvTranspose1d weights use the PyTorch layout [C_in, C_out, K].
        w1=randn(ks[0], (F, ch1, 8), 1.0 / float(jnp.sqrt(F * 8.0))),
        b1=randn(ks[1], (ch1,), 0.1),
        w2=randn(ks[2], (ch1, ch2, 8), 1.0 / float(jnp.sqrt(ch1 * 8.0))),
        b2=randn(ks[3], (ch2,), 0.1),
        w3=randn(ks[4], (ch2, ch3, S), 1.0 / float(jnp.sqrt(ch2 * float(S)))),
        b3=randn(ks[5], (ch3,), 0.1),
        # BatchNorm (inference): (gamma, beta, running_mean, running_var)
        bn1=(1.0 + 0.1 * randn(ks[6], (ch1,)), 0.1 * randn(ks[7], (ch1,)),
             0.1 * randn(ks[8], (ch1,)), 1.0 + 0.1 * jnp.abs(randn(ks[9], (ch1,)))),
        bn2=(1.0 + 0.1 * randn(ks[10], (ch2,)), 0.1 * randn(ks[11], (ch2,)),
             0.1 * randn(ks[12], (ch2,)), 1.0 + 0.1 * jnp.abs(randn(ks[13], (ch2,)))),
        bn3=(1.0 + 0.1 * randn(ks[14], (ch3,)), 0.1 * randn(ks[15], (ch3,)),
             jnp.zeros((ch3,)), jnp.ones((ch3,))),
    )

    x_in = jax.random.normal(jax.random.PRNGKey(1), (B, F), dtype=jnp.float32)
    ref = cnn_decoder_ref(x_in, params, S)

    def rel_err(a, b):
        return float(jnp.linalg.norm((a - b).ravel()) / (jnp.linalg.norm(b.ravel()) + 1e-12))

    # f32 weight path (tight correctness check; single full-batch grid step).
    folded_f32 = fold_decoder_params(params, configs, weight_dtype=jnp.float32)
    out_f32 = jax.block_until_ready(
        cnn_decoder_forward(x_in, folded_f32, sequence_len=S, input_channels=ch3))
    assert out_f32.shape == (B, ch3, S)
    assert rel_err(out_f32, ref) < 5e-3, "f32 kernel mismatch vs reference"

    # bf16 weight path (default: ~half the HBM weight bytes, f32 accumulation).
    folded_bf16 = fold_decoder_params(params, configs, weight_dtype=jnp.bfloat16)
    out_bf16 = jax.block_until_ready(
        cnn_decoder_forward(x_in, folded_bf16, sequence_len=S, input_channels=ch3))
    assert out_bf16.shape == (B, ch3, S)
    assert rel_err(out_bf16, ref) < 3e-2, "bf16 kernel mismatch vs reference"

    # int8 weight path (per-column quant, dequant folded into the post-matmul affine).
    folded_i8 = fold_decoder_params(params, configs, weight_dtype=jnp.int8)
    out_i8 = jax.block_until_ready(
        cnn_decoder_forward(x_in, folded_i8, sequence_len=S, input_channels=ch3))
    assert out_i8.shape == (B, ch3, S)
    assert rel_err(out_i8, ref) < 8e-2, "int8 kernel mismatch vs reference"

    # Multi-step "parallel" grid path (explicit tile_b override; resident weights reused).
    B2 = 32
    x2 = jax.random.normal(jax.random.PRNGKey(2), (B2, F), dtype=jnp.float32)
    ref2 = cnn_decoder_ref(x2, params, S)
    out2 = jax.block_until_ready(
        cnn_decoder_forward(x2, folded_bf16, sequence_len=S, input_channels=ch3, tile_b=16))
    assert out2.shape == (B2, ch3, S)
    assert rel_err(out2, ref2) < 3e-2, "grid>1 kernel mismatch vs reference"

    print("KERNEL_OK")
</pallas_src>

<mosaic_0001>
module attributes {stable_mosaic.version = 11 : i64} {
  func.func @_decoder_kernel(%arg0: i32, %arg1: memref<16x128xf32, #tpu.memory_space<vmem>>, %arg2: memref<128x512xf32, #tpu.memory_space<vmem>>, %arg3: memref<2x512xf32, #tpu.memory_space<vmem>>, %arg4: memref<512x640xf32, #tpu.memory_space<vmem>>, %arg5: memref<2x640xf32, #tpu.memory_space<vmem>>, %arg6: memref<640x512xf32, #tpu.memory_space<vmem>>, %arg7: memref<2x512xf32, #tpu.memory_space<vmem>>, %arg8: memref<16x512xf32, #tpu.memory_space<vmem>>) attributes {dimension_semantics = [#tpu.dimension_semantics<parallel>], iteration_bounds = array<i64: 1>, scalar_prefetch = 0 : i64, scratch_operands = 0 : i64, tpu.core_type = #tpu.core_type<tc>, window_params = [{transform_indices = @transform_0, window_bounds = array<i64: 16, 128>}, {pipeline_mode = #tpu.pipeline_mode<synchronous>, transform_indices = @transform_1, window_bounds = array<i64: 128, 512>}, {pipeline_mode = #tpu.pipeline_mode<synchronous>, transform_indices = @transform_2, window_bounds = array<i64: 2, 512>}, {pipeline_mode = #tpu.pipeline_mode<synchronous>, transform_indices = @transform_3, window_bounds = array<i64: 512, 640>}, {pipeline_mode = #tpu.pipeline_mode<synchronous>, transform_indices = @transform_4, window_bounds = array<i64: 2, 640>}, {pipeline_mode = #tpu.pipeline_mode<synchronous>, transform_indices = @transform_5, window_bounds = array<i64: 640, 512>}, {pipeline_mode = #tpu.pipeline_mode<synchronous>, transform_indices = @transform_6, window_bounds = array<i64: 2, 512>}, {transform_indices = @transform_7, window_bounds = array<i64: 16, 512>}]} {
    %c0 = arith.constant 0 : index
    %c0_0 = arith.constant 0 : index
    %0 = vector.load %arg1[%c0, %c0_0] : memref<16x128xf32, #tpu.memory_space<vmem>>, vector<16x128xf32>
    %c0_1 = arith.constant 0 : index
    %c0_2 = arith.constant 0 : index
    %1 = vector.load %arg2[%c0_1, %c0_2] : memref<128x512xf32, #tpu.memory_space<vmem>>, vector<128x512xf32>
    %cst = arith.constant dense<0.000000e+00> : vector<16x512xf32>
    %2 = tpu.matmul %0, %1, %cst {dimension_numbers = #tpu.dot_dimension_numbers<[1], [0], [0], [1], [0, 0, 1, 1], [], []>} : vector<16x128xf32>, vector<128x512xf32>, vector<16x512xf32> -> vector<16x512xf32>
    %c0_3 = arith.constant 0 : index
    %c0_4 = arith.constant 0 : index
    %3 = vector.load %arg3[%c0_3, %c0_4] : memref<2x512xf32, #tpu.memory_space<vmem>>, vector<1x512xf32>
    %4 = vector.broadcast %3 : vector<1x512xf32> to vector<16x512xf32>
    %5 = arith.mulf %2, %4 : vector<16x512xf32>
    %c1 = arith.constant 1 : index
    %c0_5 = arith.constant 0 : index
    %6 = vector.load %arg3[%c1, %c0_5] : memref<2x512xf32, #tpu.memory_space<vmem>>, vector<1x512xf32>
    %7 = vector.broadcast %6 : vector<1x512xf32> to vector<16x512xf32>
    %8 = arith.addf %5, %7 : vector<16x512xf32>
    %cst_6 = arith.constant 0.000000e+00 : f32
    %9 = vector.broadcast %cst_6 : f32 to vector<16x512xf32>
    %10 = arith.maximumf %8, %9 : vector<16x512xf32>
    %c0_7 = arith.constant 0 : index
    %c0_8 = arith.constant 0 : index
    %11 = vector.load %arg4[%c0_7, %c0_8] : memref<512x640xf32, #tpu.memory_space<vmem>>, vector<512x640xf32>
    %cst_9 = arith.constant dense<0.000000e+00> : vector<16x640xf32>
    %12 = tpu.matmul %10, %11, %cst_9 {dimension_numbers = #tpu.dot_dimension_numbers<[1], [0], [0], [1], [0, 0, 1, 1], [], []>} : vector<16x512xf32>, vector<512x640xf32>, vector<16x640xf32> -> vector<16x640xf32>
    %c0_10 = arith.constant 0 : index
    %c0_11 = arith.constant 0 : index
    %13 = vector.load %arg5[%c0_10, %c0_11] : memref<2x640xf32, #tpu.memory_space<vmem>>, vector<1x640xf32>
    %14 = vector.broadcast %13 : vector<1x640xf32> to vector<16x640xf32>
    %15 = arith.mulf %12, %14 : vector<16x640xf32>
    %c1_12 = arith.constant 1 : index
    %c0_13 = arith.constant 0 : index
    %16 = vector.load %arg5[%c1_12, %c0_13] : memref<2x640xf32, #tpu.memory_space<vmem>>, vector<1x640xf32>
    %17 = vector.broadcast %16 : vector<1x640xf32> to vector<16x640xf32>
    %18 = arith.addf %15, %17 : vector<16x640xf32>
    %cst_14 = arith.constant 0.000000e+00 : f32
    %19 = vector.broadcast %cst_14 : f32 to vector<16x640xf32>
    %20 = arith.maximumf %18, %19 : vector<16x640xf32>
    %c0_15 = arith.constant 0 : index
    %c0_16 = arith.constant 0 : index
    %21 = vector.load %arg6[%c0_15, %c0_16] : memref<640x512xf32, #tpu.memory_space<vmem>>, vector<640x512xf32>
    %cst_17 = arith.constant dense<0.000000e+00> : vector<16x512xf32>
    %22 = tpu.matmul %20, %21, %cst_17 {dimension_numbers = #tpu.dot_dimension_numbers<[1], [0], [0], [1], [0, 0, 1, 1], [], []>} : vector<16x640xf32>, vector<640x512xf32>, vector<16x512xf32> -> vector<16x512xf32>
    %c0_18 = arith.constant 0 : index
    %c0_19 = arith.constant 0 : index
    %23 = vector.load %arg7[%c0_18, %c0_19] : memref<2x512xf32, #tpu.memory_space<vmem>>, vector<1x512xf32>
    %24 = vector.broadcast %23 : vector<1x512xf32> to vector<16x512xf32>
    %25 = arith.mulf %22, %24 : vector<16x512xf32>
    %c1_20 = arith.constant 1 : index
    %c0_21 = arith.constant 0 : index
    %26 = vector.load %arg7[%c1_20, %c0_21] : memref<2x512xf32, #tpu.memory_space<vmem>>, vector<1x512xf32>
    %27 = vector.broadcast %26 : vector<1x512xf32> to vector<16x512xf32>
    %28 = arith.addf %25, %27 : vector<16x512xf32>
    %c0_22 = arith.constant 0 : index
    %c0_23 = arith.constant 0 : index
    %29 = vector.load %arg8[%c0_22, %c0_23] : memref<16x512xf32, #tpu.memory_space<vmem>>, vector<16x512xf32>
    tpu.vector_store %arg8[%c0_22, %c0_23], %28 {strides = array<i32>} : memref<16x512xf32, #tpu.memory_space<vmem>>, vector<16x512xf32>,
    return
  }
  func.func @transform_0(%arg0: i32) -> (i32, i32) {
    %c0_i32 = arith.constant 0 : i32
    %c0_i32_0 = arith.constant 0 : i32
    return %arg0, %c0_i32 : i32, i32
  }
  func.func @transform_1(%arg0: i32) -> (i32, i32) {
    %c0_i32 = arith.constant 0 : i32
    %c0_i32_0 = arith.constant 0 : i32
    %c0_i32_1 = arith.constant 0 : i32
    return %c0_i32, %c0_i32_0 : i32, i32
  }
  func.func @transform_2(%arg0: i32) -> (i32, i32) {
    %c0_i32 = arith.constant 0 : i32
    %c0_i32_0 = arith.constant 0 : i32
    %c0_i32_1 = arith.constant 0 : i32
    return %c0_i32, %c0_i32_0 : i32, i32
  }
  func.func @transform_3(%arg0: i32) -> (i32, i32) {
    %c0_i32 = arith.constant 0 : i32
    %c0_i32_0 = arith.constant 0 : i32
    %c0_i32_1 = arith.constant 0 : i32
    return %c0_i32, %c0_i32_0 : i32, i32
  }
  func.func @transform_4(%arg0: i32) -> (i32, i32) {
    %c0_i32 = arith.constant 0 : i32
    %c0_i32_0 = arith.constant 0 : i32
    %c0_i32_1 = arith.constant 0 : i32
    return %c0_i32, %c0_i32_0 : i32, i32
  }
  func.func @transform_5(%arg0: i32) -> (i32, i32) {
    %c0_i32 = arith.constant 0 : i32
    %c0_i32_0 = arith.constant 0 : i32
    %c0_i32_1 = arith.constant 0 : i32
    return %c0_i32, %c0_i32_0 : i32, i32
  }
  func.func @transform_6(%arg0: i32) -> (i32, i32) {
    %c0_i32 = arith.constant 0 : i32
    %c0_i32_0 = arith.constant 0 : i32
    %c0_i32_1 = arith.constant 0 : i32
    return %c0_i32, %c0_i32_0 : i32, i32
  }
  func.func @transform_7(%arg0: i32) -> (i32, i32) {
    %c0_i32 = arith.constant 0 : i32
    %c0_i32_0 = arith.constant 0 : i32
    return %arg0, %c0_i32 : i32, i32
  }
}

</mosaic_0001>

<bundles_post_ra>
// kernel: cnn_decoder_forward.1
= control target key start
LH: loop header
LB: loop body
LE: loop exit
PB: predicated region body
PF: predicated region fallthrough
CT: control target
= control target key end

     0   :  { %12 = vsyncpa [#allocation3], 0  ;;  %s2449_s0 = inlined_call_operand.hbm [shape: f32[16,128], index: 0, kind: input, shape index: {}]   ;;  %s2450_s1 = inlined_call_operand.hbm [shape: f32[128,512], index: 1, kind: input, shape index: {}]   ;;  %s2451_s2 = inlined_call_operand.hbm [shape: f32[2,512], index: 2, kind: input, shape index: {}]   ;;  %s2452_s3 = inlined_call_operand.hbm [shape: f32[512,640], index: 3, kind: input, shape index: {}]   ;;  %s2453_s4 = inlined_call_operand.hbm [shape: f32[2,640], index: 4, kind: input, shape index: {}]   ;;  %s2454_s5 = inlined_call_operand.hbm [shape: f32[640,512], index: 5, kind: input, shape index: {}]   ;;  %s2455_s6 = inlined_call_operand.hbm [shape: f32[2,512], index: 6, kind: input, shape index: {}]   ;;  %s2456_s7 = inlined_call_operand.vmem [shape: f32[16,512], index: 7, kind: output, shape index: {}]  }
   0x1   :  { %13 = vsyncpa [#allocation5], 0 }
   0x2   :  { %14 = vsyncpa [#allocation8], 0  ;;  %s33_s26 = sshll.u32 %s2450_s1, 4  ;;  %s34_s26 = int_to_ptr.hbm [resolvable:$true] %s33_s26 }
   0x3   :  { %15 = vsyncpa [#allocation11], 0  ;;  %s2189_s27 = smov [#allocation4]   ;;  %s57_s8 = sshll.u32 %s2452_s3, 4  ;;  %s58_s8 = int_to_ptr.hbm [resolvable:$true] %s57_s8 }
   0x4   :  { %s35_s28 = sshll.u32 %s2189_s27, 4  ;;  %s2190_s9 = smov 512   ;;  %s36_s28 = int_to_ptr.vmem [resolvable:$true] %s35_s28 }
   0x5   :  { %s2191_s10 = smov 32   ;;  %s2192_s11 = smov [#allocation7]  }
   0x6   :  { %41 = dma.hbm_to_vmem [thread:$0]  %s34_s26, 8192, %s36_s28, [#allocation5], %s2190_s9, %s2190_s9, %s2191_s10  }
   0x7   :  { %s59_s12 = sshll.u32 %s2192_s11, 4  ;;  %s2193_s13 = smov 640   ;;  %s60_s12 = int_to_ptr.vmem [resolvable:$true] %s59_s12 }
   0x8   :  { %s2194_s14 = smov 40   ;;  %s81_s16 = sshll.u32 %s2454_s5, 4  ;;  %s82_s16 = int_to_ptr.hbm [resolvable:$true] %s81_s16 }
   0x9   :  { %65 = dma.hbm_to_vmem [thread:$0]  %s58_s8, 40960, %s60_s12, [#allocation8], %s2193_s13, %s2193_s13, %s2194_s14  }
   0xa   :  { %s2195_s17 = smov [#allocation10]   ;;  %s20_s20 = sshll.u32 %s2449_s0, 4  ;;  %s21_s20 = int_to_ptr.hbm [resolvable:$true] %s20_s20 }
   0xb   :  { %s83_s18 = sshll.u32 %s2195_s17, 4  ;;  %s2196_s21 = smov [#allocation2]   ;;  %s84_s18 = int_to_ptr.vmem [resolvable:$true] %s83_s18 }
   0xc   :  { %89 = dma.hbm_to_vmem [thread:$0]  %s82_s16, 40960, %s84_s18, [#allocation11], %s2190_s9, %s2190_s9, %s2191_s10  }
   0xd   :  { %s22_s22 = sshll.u32 %s2196_s21, 4  ;;  %s2197_s23 = smov 128   ;;  %s23_s22 = int_to_ptr.vmem [resolvable:$true] %s22_s22 }
   0xe   :  { %s2198_s24 = smov 8   ;;  %s47_s5 = sshll.u32 %s2451_s2, 4  ;;  %s48_s5 = int_to_ptr.hbm [resolvable:$true] %s47_s5 }
   0xf   :  { %28 = dma.hbm_to_vmem [thread:$0]  %s21_s20, 256, %s23_s22, [#allocation3], %s2197_s23, %s2197_s23, %s2198_s24  }
  0x10   :  { %s2199_s27 = smov [#allocation6]   ;;  %s71_s0 = sshll.u32 %s2453_s4, 4  ;;  %s72_s0 = int_to_ptr.hbm [resolvable:$true] %s71_s0 }
  0x11   :  { %s49_s28 = sshll.u32 %s2199_s27, 4  ;;  %s2200_s8 = smov [#allocation9]   ;;  %s50_s28 = int_to_ptr.vmem [resolvable:$true] %s49_s28 }
  0x12   :  { %52 = dma.hbm_to_vmem [thread:$0]  %s48_s5, 128, %s50_s28, [#allocation5]  }
  0x13   :  { %s73_s9 = sshll.u32 %s2200_s8, 4  ;;  %s95_s12 = sshll.u32 %s2455_s6, 4  ;;  %s74_s9 = int_to_ptr.vmem [resolvable:$true] %s73_s9  ;;  %s96_s12 = int_to_ptr.hbm [resolvable:$true] %s95_s12 }
  0x14   :  { %76 = dma.hbm_to_vmem [thread:$0]  %s72_s0, 160, %s74_s9, [#allocation8]  }
  0x15   :  { %s2201_s2 = smov [#allocation12]  }
  0x16   :  { %s97_s13 = sshll.u32 %s2201_s2, 4  ;;  %s98_s13 = int_to_ptr.vmem [resolvable:$true] %s97_s13 }
  0x17   :  { %100 = dma.hbm_to_vmem [thread:$0]  %s96_s12, 128, %s98_s13, [#allocation11]  }
  0x18   :  { %2181 = dma.done.wait [#allocation3], 256  }
  0x19   :  { %2182 = vsyncadd [#allocation3], 4294967040 }
  0x1a   :  { %2183 = dma.done.wait [#allocation5], 8320  }
  0x1b   :  { %2184 = vsyncadd [#allocation5], 4294958976 }
  0x1c   :  { %2185 = dma.done.wait [#allocation8], 41120  }
  0x1d   :  { %2186 = vsyncadd [#allocation8], 4294926176 }
  0x1e   :  { %2187 = dma.done.wait [#allocation11], 41088  }
  0x1f   :  { %2188 = vsyncadd [#allocation11], 4294926208  ;;  %v191_v0 = vld [vmem:[#allocation4 + $0x1e0] sm:$0xff]  ;;  %v192_v1 = vld [vmem:[#allocation4 + $0x1e8] sm:$0xff] }
  0x20   :  { %v193_v2 = vld [vmem:[#allocation4 + $0x1f0] sm:$0xff]  ;;  %195 = vmatpush.msra.mxu0 %v191_v0  ;;  %218 = vmatpush.msra.mxu1 %v192_v1  ;;  %v194_v3 = vld [vmem:[#allocation4 + $0x1f8] sm:$0xff]  ;;  %v187_v4 = vld [vmem:[#allocation4 + $0x1c0] sm:$0xff] }
  0x21   :  { %v188_v5 = vld [vmem:[#allocation4 + $0x1c8] sm:$0xff]  ;;  %241 = vmatpush.msra.mxu2 %v193_v2  ;;  %264 = vmatpush.msra.mxu3 %v194_v3  ;;  %v189_v6 = vld [vmem:[#allocation4 + $0x1d0] sm:$0xff]  ;;  %v190_v7 = vld [vmem:[#allocation4 + $0x1d8] sm:$0xff] }
  0x22   :  { %v183_v8 = vld [vmem:[#allocation4 + $0x1a0] sm:$0xff]  ;;  %196 = vmatpush.msra.mxu0 %v187_v4  ;;  %219 = vmatpush.msra.mxu1 %v188_v5  ;;  %v184_v9 = vld [vmem:[#allocation4 + $0x1a8] sm:$0xff]  ;;  %v185_v10 = vld [vmem:[#allocation4 + $0x1b0] sm:$0xff] }
  0x23   :  { %v186_v11 = vld [vmem:[#allocation4 + $0x1b8] sm:$0xff]  ;;  %242 = vmatpush.msra.mxu2 %v189_v6  ;;  %265 = vmatpush.msra.mxu3 %v190_v7  ;;  %v179_v12 = vld [vmem:[#allocation4 + $0x180] sm:$0xff]  ;;  %v180_v13 = vld [vmem:[#allocation4 + $0x188] sm:$0xff] }
  0x24   :  { %197 = vmatpush.msra.mxu0 %v183_v8  ;;  %220 = vmatpush.msra.mxu1 %v184_v9  ;;  %v181_v14 = vld [vmem:[#allocation4 + $0x190] sm:$0xff]  ;;  %v182_v15 = vld [vmem:[#allocation4 + $0x198] sm:$0xff]  ;;  %v175_v16 = vld [vmem:[#allocation4 + $0x160] sm:$0xff] }
  0x25   :  { %243 = vmatpush.msra.mxu2 %v185_v10  ;;  %266 = vmatpush.msra.mxu3 %v186_v11  ;;  %v176_v17 = vld [vmem:[#allocation4 + $0x168] sm:$0xff]  ;;  %v177_v18 = vld [vmem:[#allocation4 + $0x170] sm:$0xff]  ;;  %v178_v19 = vld [vmem:[#allocation4 + $0x178] sm:$0xff] }
  0x26   :  { %198 = vmatpush.msra.mxu0 %v179_v12  ;;  %221 = vmatpush.msra.mxu1 %v180_v13  ;;  %v171_v20 = vld [vmem:[#allocation4 + $0x140] sm:$0xff]  ;;  %v172_v21 = vld [vmem:[#allocation4 + $0x148] sm:$0xff]  ;;  %v173_v22 = vld [vmem:[#allocation4 + $0x150] sm:$0xff] }
  0x27   :  { %244 = vmatpush.msra.mxu2 %v181_v14  ;;  %267 = vmatpush.msra.mxu3 %v182_v15  ;;  %v174_v23 = vld [vmem:[#allocation4 + $0x158] sm:$0xff]  ;;  %v167_v24 = vld [vmem:[#allocation4 + $0x120] sm:$0xff]  ;;  %v168_v25 = vld [vmem:[#allocation4 + $0x128] sm:$0xff] }
  0x28   :  { %199 = vmatpush.msra.mxu0 %v175_v16  ;;  %222 = vmatpush.msra.mxu1 %v176_v17  ;;  %v169_v26 = vld [vmem:[#allocation4 + $0x130] sm:$0xff]  ;;  %v170_v27 = vld [vmem:[#allocation4 + $0x138] sm:$0xff]  ;;  %v163_v28 = vld [vmem:[#allocation4 + $0x100] sm:$0xff] }
  0x29   :  { %245 = vmatpush.msra.mxu2 %v177_v18  ;;  %268 = vmatpush.msra.mxu3 %v178_v19  ;;  %v164_v29 = vld [vmem:[#allocation4 + $0x108] sm:$0xff]  ;;  %v165_v30 = vld [vmem:[#allocation4 + $0x110] sm:$0xff]  ;;  %v166_v31 = vld [vmem:[#allocation4 + $0x118] sm:$0xff] }
  0x2a   :  { %200 = vmatpush.msra.mxu0 %v171_v20  ;;  %223 = vmatpush.msra.mxu1 %v172_v21  ;;  %v159_v32 = vld [vmem:[#allocation4 + $0xe0] sm:$0xff]  ;;  %v160_v33 = vld [vmem:[#allocation4 + $0xe8] sm:$0xff]  ;;  %v161_v34 = vld [vmem:[#allocation4 + $0xf0] sm:$0xff] }
  0x2b   :  { %246 = vmatpush.msra.mxu2 %v173_v22  ;;  %269 = vmatpush.msra.mxu3 %v174_v23  ;;  %v162_v35 = vld [vmem:[#allocation4 + $0xf8] sm:$0xff]  ;;  %v155_v36 = vld [vmem:[#allocation4 + $0xc0] sm:$0xff]  ;;  %v156_v37 = vld [vmem:[#allocation4 + $0xc8] sm:$0xff] }
  0x2c   :  { %201 = vmatpush.msra.mxu0 %v167_v24  ;;  %224 = vmatpush.msra.mxu1 %v168_v25  ;;  %v157_v38 = vld [vmem:[#allocation4 + $0xd0] sm:$0xff]  ;;  %v158_v39 = vld [vmem:[#allocation4 + $0xd8] sm:$0xff]  ;;  %v151_v40 = vld [vmem:[#allocation4 + $0xa0] sm:$0xff] }
  0x2d   :  { %247 = vmatpush.msra.mxu2 %v169_v26  ;;  %270 = vmatpush.msra.mxu3 %v170_v27  ;;  %v152_v41 = vld [vmem:[#allocation4 + $0xa8] sm:$0xff]  ;;  %v153_v42 = vld [vmem:[#allocation4 + $0xb0] sm:$0xff]  ;;  %v154_v43 = vld [vmem:[#allocation4 + $0xb8] sm:$0xff] }
  0x2e   :  { %202 = vmatpush.msra.mxu0 %v163_v28  ;;  %225 = vmatpush.msra.mxu1 %v164_v29  ;;  %v147_v44 = vld [vmem:[#allocation4 + $0x80] sm:$0xff]  ;;  %v148_v45 = vld [vmem:[#allocation4 + $0x88] sm:$0xff]  ;;  %v149_v46 = vld [vmem:[#allocation4 + $0x90] sm:$0xff] }
  0x2f   :  { %248 = vmatpush.msra.mxu2 %v165_v30  ;;  %271 = vmatpush.msra.mxu3 %v166_v31  ;;  %v150_v47 = vld [vmem:[#allocation4 + $0x98] sm:$0xff]  ;;  %v143_v48 = vld [vmem:[#allocation4 + $0x60] sm:$0xff]  ;;  %v144_v49 = vld [vmem:[#allocation4 + $0x68] sm:$0xff] }
  0x30   :  { %203 = vmatpush.msra.mxu0 %v159_v32  ;;  %226 = vmatpush.msra.mxu1 %v160_v33  ;;  %v145_v50 = vld [vmem:[#allocation4 + $0x70] sm:$0xff]  ;;  %v146_v51 = vld [vmem:[#allocation4 + $0x78] sm:$0xff]  ;;  %v139_v52 = vld [vmem:[#allocation4 + $0x40] sm:$0xff] }
  0x31   :  { %249 = vmatpush.msra.mxu2 %v161_v34  ;;  %272 = vmatpush.msra.mxu3 %v162_v35  ;;  %v140_v53 = vld [vmem:[#allocation4 + $0x48] sm:$0xff]  ;;  %v141_v54 = vld [vmem:[#allocation4 + $0x50] sm:$0xff]  ;;  %v142_v55 = vld [vmem:[#allocation4 + $0x58] sm:$0xff] }
  0x32   :  { %204 = vmatpush.msra.mxu0 %v155_v36  ;;  %227 = vmatpush.msra.mxu1 %v156_v37  ;;  %v135_v56 = vld [vmem:[#allocation4 + $0x20] sm:$0xff]  ;;  %v136_v57 = vld [vmem:[#allocation4 + $0x28] sm:$0xff]  ;;  %v137_v58 = vld [vmem:[#allocation4 + $0x30] sm:$0xff] }
  0x33   :  { %250 = vmatpush.msra.mxu2 %v157_v38  ;;  %273 = vmatpush.msra.mxu3 %v158_v39  ;;  %v138_v59 = vld [vmem:[#allocation4 + $0x38] sm:$0xff]  ;;  %v131_v60 = vld [vmem:[#allocation4] sm:$0xff]  ;;  %v132_v61 = vld [vmem:[#allocation4 + $0x8] sm:$0xff] }
  0x34   :  { %205 = vmatpush.msra.mxu0 %v151_v40  ;;  %228 = vmatpush.msra.mxu1 %v152_v41  ;;  %v133_v62 = vld [vmem:[#allocation4 + $0x10] sm:$0xff]  ;;  %v134_v63 = vld [vmem:[#allocation4 + $0x18] sm:$0xff]  ;;  %v407_v1 = vld [vmem:[#allocation7 + $0x258] sm:$0xff] }
  0x35   :  { %251 = vmatpush.msra.mxu2 %v153_v42  ;;  %274 = vmatpush.msra.mxu3 %v154_v43  ;;  %v129_v0 = vld [vmem:[#allocation2] sm:$0xff]  ;;  %v487_v2 = vld [vmem:[#allocation7 + $0x4d8] sm:$0xff]  ;;  %v402_v5 = vld [vmem:[#allocation7 + $0x230] sm:$0xff] }
  0x36   :  { %206 = vmatpush.msra.mxu0 %v147_v44  ;;  %229 = vmatpush.msra.mxu1 %v148_v45  ;;  %v567_v3 = vld [vmem:[#allocation7 + $0x758] sm:$0xff]  ;;  %v482_v6 = vld [vmem:[#allocation7 + $0x4b0] sm:$0xff]  ;;  %v397_v9 = vld [vmem:[#allocation7 + $0x208] sm:$0xff] }
  0x37   :  { %252 = vmatpush.msra.mxu2 %v149_v46  ;;  %275 = vmatpush.msra.mxu3 %v150_v47  ;;  %v647_v4 = vld [vmem:[#allocation7 + $0x9d8] sm:$0xff]  ;;  %v562_v7 = vld [vmem:[#allocation7 + $0x730] sm:$0xff]  ;;  %v477_v10 = vld [vmem:[#allocation7 + $0x488] sm:$0xff] }
  0x38   :  { %207 = vmatpush.msra.mxu0 %v143_v48  ;;  %230 = vmatpush.msra.mxu1 %v144_v49  ;;  %v642_v8 = vld [vmem:[#allocation7 + $0x9b0] sm:$0xff]  ;;  %v557_v11 = vld [vmem:[#allocation7 + $0x708] sm:$0xff]  ;;  %v392_v14 = vld [vmem:[#allocation7 + $0x1e0] sm:$0xff] }
  0x39   :  { %253 = vmatpush.msra.mxu2 %v145_v50  ;;  %276 = vmatpush.msra.mxu3 %v146_v51  ;;  %v637_v12 = vld [vmem:[#allocation7 + $0x988] sm:$0xff]  ;;  %v130_v13 = vld [vmem:[#allocation2 + $0x8] sm:$0xff]  ;;  %v472_v15 = vld [vmem:[#allocation7 + $0x460] sm:$0xff] }
  0x3a   :  { %208 = vmatpush.msra.mxu0 %v139_v52  ;;  %231 = vmatpush.msra.mxu1 %v140_v53  ;;  %v552_v16 = vld [vmem:[#allocation7 + $0x6e0] sm:$0xff]  ;;  %v387_v18 = vld [vmem:[#allocation7 + $0x1b8] sm:$0xff]  ;;  %v382_v22 = vld [vmem:[#allocation7 + $0x190] sm:$0xff] }
  0x3b   :  { %254 = vmatpush.msra.mxu2 %v141_v54  ;;  %277 = vmatpush.msra.mxu3 %v142_v55  ;;  %v632_v17 = vld [vmem:[#allocation7 + $0x960] sm:$0xff]  ;;  %v467_v19 = vld [vmem:[#allocation7 + $0x438] sm:$0xff]  ;;  %v462_v23 = vld [vmem:[#allocation7 + $0x410] sm:$0xff] }
  0x3c   :  { %209 = vmatpush.msra.mxu0 %v135_v56  ;;  %232 = vmatpush.msra.mxu1 %v136_v57  ;;  %v547_v20 = vld [vmem:[#allocation7 + $0x6b8] sm:$0xff]  ;;  %v542_v24 = vld [vmem:[#allocation7 + $0x690] sm:$0xff]  ;;  %v377_v26 = vld [vmem:[#allocation7 + $0x168] sm:$0xff] }
  0x3d   :  { %255 = vmatpush.msra.mxu2 %v137_v58  ;;  %278 = vmatpush.msra.mxu3 %v138_v59  ;;  %v627_v21 = vld [vmem:[#allocation7 + $0x938] sm:$0xff]  ;;  %v622_v25 = vld [vmem:[#allocation7 + $0x910] sm:$0xff]  ;;  %v457_v27 = vld [vmem:[#allocation7 + $0x3e8] sm:$0xff] }
  0x3e   :  { %210 = vmatpush.msra.mxu0 %v131_v60  ;;  %233 = vmatpush.msra.mxu1 %v132_v61  ;;  %v537_v28 = vld [vmem:[#allocation7 + $0x668] sm:$0xff]  ;;  %v372_v30 = vld [vmem:[#allocation7 + $0x140] sm:$0xff]  ;;  %v367_v34 = vld [vmem:[#allocation7 + $0x118] sm:$0xff] }
  0x3f   :  { %256 = vmatpush.msra.mxu2 %v133_v62  ;;  %279 = vmatpush.msra.mxu3 %v134_v63  ;;  %v617_v29 = vld [vmem:[#allocation7 + $0x8e8] sm:$0xff]  ;;  %v452_v31 = vld [vmem:[#allocation7 + $0x3c0] sm:$0xff]  ;;  %v447_v35 = vld [vmem:[#allocation7 + $0x398] sm:$0xff] }
  0x40   :  { %211 = vmatmul.f32.vlgmr.msra.gmra.mxu0 %v129_v0  ;;  %234 = vmatmul.f32.vlgmr.msra.gmra.mxu1 %v129_v0  ;;  %v532_v32 = vld [vmem:[#allocation7 + $0x640] sm:$0xff]  ;;  %v527_v36 = vld [vmem:[#allocation7 + $0x618] sm:$0xff]  ;;  %v362_v38 = vld [vmem:[#allocation7 + $0xf0] sm:$0xff] }
  0x41   :  { %257 = vmatmul.f32.vlgmr.msra.gmra.mxu2 %v129_v0  ;;  %280 = vmatmul.f32.vlgmr.msra.gmra.mxu3 %v129_v0  ;;  %v612_v33 = vld [vmem:[#allocation7 + $0x8c0] sm:$0xff]  ;;  %v607_v37 = vld [vmem:[#allocation7 + $0x898] sm:$0xff]  ;;  %v442_v39 = vld [vmem:[#allocation7 + $0x370] sm:$0xff] }
  0x42   :  { %652 = vmatpush.msrb.mxu0 %v407_v1  ;;  %675 = vmatpush.msrb.mxu1 %v487_v2  ;;  %v522_v40 = vld [vmem:[#allocation7 + $0x5f0] sm:$0xff]  ;;  %v357_v42 = vld [vmem:[#allocation7 + $0xc8] sm:$0xff]  ;;  %v352_v46 = vld [vmem:[#allocation7 + $0xa0] sm:$0xff] }
  0x43   :  { %698 = vmatpush.msrb.mxu2 %v567_v3  ;;  %721 = vmatpush.msrb.mxu3 %v647_v4  ;;  %v602_v41 = vld [vmem:[#allocation7 + $0x870] sm:$0xff]  ;;  %v437_v43 = vld [vmem:[#allocation7 + $0x348] sm:$0xff]  ;;  %v432_v47 = vld [vmem:[#allocation7 + $0x320] sm:$0xff] }
  0x44   :  { %653 = vmatpush.msrb.mxu0 %v402_v5  ;;  %676 = vmatpush.msrb.mxu1 %v482_v6  ;;  %v517_v44 = vld [vmem:[#allocation7 + $0x5c8] sm:$0xff]  ;;  %v512_v48 = vld [vmem:[#allocation7 + $0x5a0] sm:$0xff]  ;;  %v347_v50 = vld [vmem:[#allocation7 + $0x78] sm:$0xff] }
  0x45   :  { %699 = vmatpush.msrb.mxu2 %v562_v7  ;;  %722 = vmatpush.msrb.mxu3 %v642_v8  ;;  %v597_v45 = vld [vmem:[#allocation7 + $0x848] sm:$0xff]  ;;  %v592_v49 = vld [vmem:[#allocation7 + $0x820] sm:$0xff]  ;;  %v427_v51 = vld [vmem:[#allocation7 + $0x2f8] sm:$0xff] }
  0x46   :  { %654 = vmatpush.msrb.mxu0 %v397_v9  ;;  %677 = vmatpush.msrb.mxu1 %v477_v10  ;;  %v507_v52 = vld [vmem:[#allocation7 + $0x578] sm:$0xff]  ;;  %v342_v54 = vld [vmem:[#allocation7 + $0x50] sm:$0xff]  ;;  %v337_v58 = vld [vmem:[#allocation7 + $0x28] sm:$0xff] }
  0x47   :  { %700 = vmatpush.msrb.mxu2 %v557_v11  ;;  %723 = vmatpush.msrb.mxu3 %v637_v12  ;;  %v587_v53 = vld [vmem:[#allocation7 + $0x7f8] sm:$0xff]  ;;  %v422_v55 = vld [vmem:[#allocation7 + $0x2d0] sm:$0xff]  ;;  %v417_v59 = vld [vmem:[#allocation7 + $0x2a8] sm:$0xff] }
  0x48   :  { %214 = vmatmul.f32.gmra.mxu0 %v130_v13  ;;  %237 = vmatmul.f32.gmra.mxu1 %v130_v13  ;;  %v502_v56 = vld [vmem:[#allocation7 + $0x550] sm:$0xff]  ;;  %v497_v60 = vld [vmem:[#allocation7 + $0x528] sm:$0xff]  ;;  %v332_v62 = vld [vmem:[#allocation7] sm:$0xff] }
  0x49   :  { %260 = vmatmul.f32.gmra.mxu2 %v130_v13  ;;  %283 = vmatmul.f32.gmra.mxu3 %v130_v13  ;;  %v582_v57 = vld [vmem:[#allocation7 + $0x7d0] sm:$0xff]  ;;  %v577_v61 = vld [vmem:[#allocation7 + $0x7a8] sm:$0xff]  ;;  %v412_v63 = vld [vmem:[#allocation7 + $0x280] sm:$0xff] }
  0x4a   :  { %655 = vmatpush.msrb.mxu0 %v392_v14  ;;  %678 = vmatpush.msrb.mxu1 %v472_v15  ;;  %v408_v0 = vld [vmem:[#allocation7 + $0x260] sm:$0xff]  ;;  %v403_v4 = vld [vmem:[#allocation7 + $0x238] sm:$0xff]  ;;  %v398_v8 = vld [vmem:[#allocation7 + $0x210] sm:$0xff] }
  0x4b   :  { %701 = vmatpush.msrb.mxu2 %v552_v16  ;;  %724 = vmatpush.msrb.mxu3 %v632_v17  ;;  %v488_v1 = vld [vmem:[#allocation7 + $0x4e0] sm:$0xff]  ;;  %v483_v5 = vld [vmem:[#allocation7 + $0x4b8] sm:$0xff]  ;;  %v478_v9 = vld [vmem:[#allocation7 + $0x490] sm:$0xff] }
  0x4c   :  { %656 = vmatpush.msrb.mxu0 %v387_v18  ;;  %679 = vmatpush.msrb.mxu1 %v467_v19  ;;  %v492_v2 = vld [vmem:[#allocation7 + $0x500] sm:$0xff]  ;;  %v563_v10 = vld [vmem:[#allocation7 + $0x738] sm:$0xff]  ;;  %v393_v12 = vld [vmem:[#allocation7 + $0x1e8] sm:$0xff] }
  0x4d   :  { %702 = vmatpush.msrb.mxu2 %v547_v20  ;;  %725 = vmatpush.msrb.mxu3 %v627_v21  ;;  %v572_v3 = vld [vmem:[#allocation7 + $0x780] sm:$0xff]  ;;  %v643_v11 = vld [vmem:[#allocation7 + $0x9b8] sm:$0xff]  ;;  %v473_v13 = vld [vmem:[#allocation7 + $0x468] sm:$0xff] }
  0x4e   :  { %657 = vmatpush.msrb.mxu0 %v382_v22  ;;  %680 = vmatpush.msrb.mxu1 %v462_v23  ;;  %v568_v6 = vld [vmem:[#allocation7 + $0x760] sm:$0xff]  ;;  %v558_v14 = vld [vmem:[#allocation7 + $0x710] sm:$0xff]  ;;  %v553_v18 = vld [vmem:[#allocation7 + $0x6e8] sm:$0xff] }
  0x4f   :  { %703 = vmatpush.msrb.mxu2 %v542_v24  ;;  %726 = vmatpush.msrb.mxu3 %v622_v25  ;;  %v648_v7 = vld [vmem:[#allocation7 + $0x9e0] sm:$0xff]  ;;  %v638_v15 = vld [vmem:[#allocation7 + $0x990] sm:$0xff]  ;;  %v633_v19 = vld [vmem:[#allocation7 + $0x968] sm:$0xff] }
  0x50   :  { %658 = vmatpush.msrb.mxu0 %v377_v26  ;;  %681 = vmatpush.msrb.mxu1 %v457_v27  ;;  %v388_v16 = vld [vmem:[#allocation7 + $0x1c0] sm:$0xff]  ;;  %v383_v20 = vld [vmem:[#allocation7 + $0x198] sm:$0xff]  ;;  %v378_v24 = vld [vmem:[#allocation7 + $0x170] sm:$0xff] }
  0x51   :  { %704 = vmatpush.msrb.mxu2 %v537_v28  ;;  %727 = vmatpush.msrb.mxu3 %v617_v29  ;;  %v468_v17 = vld [vmem:[#allocation7 + $0x440] sm:$0xff]  ;;  %v463_v21 = vld [vmem:[#allocation7 + $0x418] sm:$0xff]  ;;  %v458_v25 = vld [vmem:[#allocation7 + $0x3f0] sm:$0xff] }
  0x52   :  { %659 = vmatpush.msrb.mxu0 %v372_v30  ;;  %682 = vmatpush.msrb.mxu1 %v452_v31  ;;  %v548_v22 = vld [vmem:[#allocation7 + $0x6c0] sm:$0xff]  ;;  %v543_v26 = vld [vmem:[#allocation7 + $0x698] sm:$0xff]  ;;  %v373_v28 = vld [vmem:[#allocation7 + $0x148] sm:$0xff] }
  0x53   :  { %705 = vmatpush.msrb.mxu2 %v532_v32  ;;  %728 = vmatpush.msrb.mxu3 %v612_v33  ;;  %v628_v23 = vld [vmem:[#allocation7 + $0x940] sm:$0xff]  ;;  %v623_v27 = vld [vmem:[#allocation7 + $0x918] sm:$0xff]  ;;  %v453_v29 = vld [vmem:[#allocation7 + $0x3c8] sm:$0xff] }
  0x54   :  { %660 = vmatpush.msrb.mxu0 %v367_v34  ;;  %683 = vmatpush.msrb.mxu1 %v447_v35  ;;  %v538_v30 = vld [vmem:[#allocation7 + $0x670] sm:$0xff]  ;;  %v368_v32 = vld [vmem:[#allocation7 + $0x120] sm:$0xff]  ;;  %v533_v34 = vld [vmem:[#allocation7 + $0x648] sm:$0xff] }
  0x55   :  { %706 = vmatpush.msrb.mxu2 %v527_v36  ;;  %729 = vmatpush.msrb.mxu3 %v607_v37  ;;  %v618_v31 = vld [vmem:[#allocation7 + $0x8f0] sm:$0xff]  ;;  %v448_v33 = vld [vmem:[#allocation7 + $0x3a0] sm:$0xff]  ;;  %v613_v35 = vld [vmem:[#allocation7 + $0x8c8] sm:$0xff] }
  0x56   :  { %661 = vmatpush.msrb.mxu0 %v362_v38  ;;  %684 = vmatpush.msrb.mxu1 %v442_v39  ;;  %v363_v36 = vld [vmem:[#allocation7 + $0xf8] sm:$0xff]  ;;  %v528_v38 = vld [vmem:[#allocation7 + $0x620] sm:$0xff] }
  0x57   :  { %707 = vmatpush.msrb.mxu2 %v522_v40  ;;  %730 = vmatpush.msrb.mxu3 %v602_v41  ;;  %v443_v37 = vld [vmem:[#allocation7 + $0x378] sm:$0xff]  ;;  %v608_v39 = vld [vmem:[#allocation7 + $0x8a0] sm:$0xff]  ;;  %v358_v40 = vld [vmem:[#allocation7 + $0xd0] sm:$0xff] }
  0x58   :  { %662 = vmatpush.msrb.mxu0 %v357_v42  ;;  %685 = vmatpush.msrb.mxu1 %v437_v43  ;;  %v438_v41 = vld [vmem:[#allocation7 + $0x350] sm:$0xff]  ;;  %v353_v42 = vld [vmem:[#allocation7 + $0xa8] sm:$0xff] }
  0x59   :  { %708 = vmatpush.msrb.mxu2 %v517_v44  ;;  %731 = vmatpush.msrb.mxu3 %v597_v45  ;;  %v433_v43 = vld [vmem:[#allocation7 + $0x328] sm:$0xff]  ;;  %v348_v44 = vld [vmem:[#allocation7 + $0x80] sm:$0xff] }
  0x5a   :  { %663 = vmatpush.msrb.mxu0 %v352_v46  ;;  %686 = vmatpush.msrb.mxu1 %v432_v47  ;;  %v428_v45 = vld [vmem:[#allocation7 + $0x300] sm:$0xff]  ;;  %v523_v46 = vld [vmem:[#allocation7 + $0x5f8] sm:$0xff] }
  0x5b   :  { %709 = vmatpush.msrb.mxu2 %v512_v48  ;;  %732 = vmatpush.msrb.mxu3 %v592_v49  ;;  %v603_v47 = vld [vmem:[#allocation7 + $0x878] sm:$0xff] }
  0x5c   :  { %664 = vmatpush.msrb.mxu0 %v347_v50  ;;  %687 = vmatpush.msrb.mxu1 %v427_v51  ;;  %v343_v48 = vld [vmem:[#allocation7 + $0x58] sm:$0xff]  ;;  %v518_v50 = vld [vmem:[#allocation7 + $0x5d0] sm:$0xff] }
  0x5d   :  { %710 = vmatpush.msrb.mxu2 %v507_v52  ;;  %733 = vmatpush.msrb.mxu3 %v587_v53  ;;  %v423_v49 = vld [vmem:[#allocation7 + $0x2d8] sm:$0xff]  ;;  %v598_v51 = vld [vmem:[#allocation7 + $0x850] sm:$0xff] }
  0x5e   :  { %665 = vmatpush.msrb.mxu0 %v342_v54  ;;  %688 = vmatpush.msrb.mxu1 %v422_v55  ;;  %v338_v52 = vld [vmem:[#allocation7 + $0x30] sm:$0xff]  ;;  %v513_v54 = vld [vmem:[#allocation7 + $0x5a8] sm:$0xff] }
  0x5f   :  { %711 = vmatpush.msrb.mxu2 %v502_v56  ;;  %734 = vmatpush.msrb.mxu3 %v582_v57  ;;  %v418_v53 = vld [vmem:[#allocation7 + $0x2b0] sm:$0xff]  ;;  %v593_v55 = vld [vmem:[#allocation7 + $0x828] sm:$0xff] }
  0x60   :  { %666 = vmatpush.msrb.mxu0 %v337_v58  ;;  %689 = vmatpush.msrb.mxu1 %v417_v59  ;;  %v333_v56 = vld [vmem:[#allocation7 + $0x8] sm:$0xff]  ;;  %v508_v58 = vld [vmem:[#allocation7 + $0x580] sm:$0xff] }
  0x61   :  { %712 = vmatpush.msrb.mxu2 %v497_v60  ;;  %735 = vmatpush.msrb.mxu3 %v577_v61  ;;  %v413_v57 = vld [vmem:[#allocation7 + $0x288] sm:$0xff]  ;;  %v588_v59 = vld [vmem:[#allocation7 + $0x800] sm:$0xff]  ;;  %v503_v60 = vld [vmem:[#allocation7 + $0x558] sm:$0xff] }
  0x62   :  { %667 = vmatpush.msrb.mxu0 %v332_v62  ;;  %690 = vmatpush.msrb.mxu1 %v412_v63  ;;  %v583_v61 = vld [vmem:[#allocation7 + $0x7d8] sm:$0xff]  ;;  %v498_v62 = vld [vmem:[#allocation7 + $0x530] sm:$0xff] }
  0x63   :  { %713 = vmatpush.msrb.mxu2 %v492_v2  ;;  %736 = vmatpush.msrb.mxu3 %v572_v3  ;;  %v578_v63 = vld [vmem:[#allocation7 + $0x7b0] sm:$0xff]  ;;  %v2263_v2 = vld [vmem:[#allocation6] ss:$2 sm:$0xf] }
  0x64   :  { %744 = vmatpush.msra.mxu0 %v408_v0  ;;  %767 = vmatpush.msra.mxu1 %v488_v1  ;;  %v493_v0 = vld [vmem:[#allocation7 + $0x508] sm:$0xff]  ;;  %v2265_v3 = vld [vmem:[#allocation6 + $0x1] ss:$2 sm:$0xf] }
  0x65   :  { %790 = vmatpush.msra.mxu2 %v568_v6  ;;  %813 = vmatpush.msra.mxu3 %v648_v7  ;;  %v573_v1 = vld [vmem:[#allocation7 + $0x788] sm:$0xff]  ;;  %v308_v6 = vperm.slane %v2265_v3, 0  ;;  %v309_v7 = vperm.slane %v2265_v3, 1 }
  0x66   :  { %745 = vmatpush.msra.mxu0 %v403_v4  ;;  %768 = vmatpush.msra.mxu1 %v483_v5  ;;  %v289_v4 = vperm.slane %v2263_v2, 0  ;;  %v290_v5 = vperm.slane %v2263_v2, 1 }
  0x67   :  { %791 = vmatpush.msra.mxu2 %v563_v10  ;;  %814 = vmatpush.msra.mxu3 %v643_v11 }
  0x68   :  { %746 = vmatpush.msra.mxu0 %v398_v8  ;;  %769 = vmatpush.msra.mxu1 %v478_v9 }
  0x69   :  { %792 = vmatpush.msra.mxu2 %v558_v14  ;;  %815 = vmatpush.msra.mxu3 %v638_v15  ;;  %v291_v14 = vperm.slane %v2263_v2, 2  ;;  %v292_v15 = vperm.slane %v2263_v2, 3  ;;  %v374_v2 = vld [vmem:[#allocation7 + $0x150] sm:$0xff] }
  0x6a   :  { %747 = vmatpush.msra.mxu0 %v393_v12  ;;  %770 = vmatpush.msra.mxu1 %v473_v13 }
  0x6b   :  { %793 = vmatpush.msra.mxu2 %v553_v18  ;;  %816 = vmatpush.msra.mxu3 %v633_v19  ;;  %v409_v18 = vld [vmem:[#allocation7 + $0x268] sm:$0xff] }
  0x6c   :  { %748 = vmatpush.msra.mxu0 %v388_v16  ;;  %771 = vmatpush.msra.mxu1 %v468_v17  ;;  %v489_v19 = vld [vmem:[#allocation7 + $0x4e8] sm:$0xff] }
  0x6d   :  { %794 = vmatpush.msra.mxu2 %v548_v22  ;;  %817 = vmatpush.msra.mxu3 %v628_v23 }
  0x6e   :  { %749 = vmatpush.msra.mxu0 %v383_v20  ;;  %772 = vmatpush.msra.mxu1 %v463_v21  ;;  %v310_v20 = vperm.slane %v2265_v3, 2  ;;  %v311_v21 = vperm.slane %v2265_v3, 3  ;;  %v454_v3 = vld [vmem:[#allocation7 + $0x3d0] sm:$0xff] }
  0x6f   :  { %795 = vmatpush.msra.mxu2 %v543_v26  ;;  %818 = vmatpush.msra.mxu3 %v623_v27 }
  0x70   :  { %750 = vmatpush.msra.mxu0 %v378_v24  ;;  %773 = vmatpush.msra.mxu1 %v458_v25  ;;  %v404_v24 = vld [vmem:[#allocation7 + $0x240] sm:$0xff] }
  0x71   :  { %796 = vmatpush.msra.mxu2 %v538_v30  ;;  %819 = vmatpush.msra.mxu3 %v618_v31  ;;  %v484_v25 = vld [vmem:[#allocation7 + $0x4c0] sm:$0xff] }
  0x72   :  { %751 = vmatpush.msra.mxu0 %v373_v28  ;;  %774 = vmatpush.msra.mxu1 %v453_v29 }
  0x73   :  { %797 = vmatpush.msra.mxu2 %v533_v34  ;;  %820 = vmatpush.msra.mxu3 %v613_v35 }
  0x74   :  { %752 = vmatpush.msra.mxu0 %v368_v32  ;;  %775 = vmatpush.msra.mxu1 %v448_v33  ;;  %v399_v32 = vld [vmem:[#allocation7 + $0x218] sm:$0xff] }
  0x75   :  { %798 = vmatpush.msra.mxu2 %v528_v38  ;;  %821 = vmatpush.msra.mxu3 %v608_v39  ;;  %v479_v33 = vld [vmem:[#allocation7 + $0x498] sm:$0xff] }
  0x76   :  { %753 = vmatpush.msra.mxu0 %v363_v36  ;;  %776 = vmatpush.msra.mxu1 %v443_v37 }
  0x77   :  { %799 = vmatpush.msra.mxu2 %v523_v46  ;;  %822 = vmatpush.msra.mxu3 %v603_v47 }
  0x78   :  { %754 = vmatpush.msra.mxu0 %v358_v40  ;;  %777 = vmatpush.msra.mxu1 %v438_v41  ;;  %v394_v40 = vld [vmem:[#allocation7 + $0x1f0] sm:$0xff] }
  0x79   :  { %800 = vmatpush.msra.mxu2 %v518_v50  ;;  %823 = vmatpush.msra.mxu3 %v598_v51  ;;  %v474_v41 = vld [vmem:[#allocation7 + $0x470] sm:$0xff] }
  0x7a   :  { %755 = vmatpush.msra.mxu0 %v353_v42  ;;  %778 = vmatpush.msra.mxu1 %v433_v43 }
  0x7b   :  { %801 = vmatpush.msra.mxu2 %v513_v54  ;;  %824 = vmatpush.msra.mxu3 %v593_v55  ;;  %v384_v54 = vld [vmem:[#allocation7 + $0x1a0] sm:$0xff] }
  0x7c   :  { %756 = vmatpush.msra.mxu0 %v348_v44  ;;  %779 = vmatpush.msra.mxu1 %v428_v45  ;;  %v569_v44 = vld [vmem:[#allocation7 + $0x768] sm:$0xff]  ;;  %v464_v55 = vld [vmem:[#allocation7 + $0x420] sm:$0xff] }
  0x7d   :  { %802 = vmatpush.msra.mxu2 %v508_v58  ;;  %825 = vmatpush.msra.mxu3 %v588_v59  ;;  %v649_v45 = vld [vmem:[#allocation7 + $0x9e8] sm:$0xff]  ;;  %v559_v58 = vld [vmem:[#allocation7 + $0x718] sm:$0xff] }
  0x7e   :  { %757 = vmatpush.msra.mxu0 %v343_v48  ;;  %780 = vmatpush.msra.mxu1 %v423_v49  ;;  %v389_v48 = vld [vmem:[#allocation7 + $0x1c8] sm:$0xff]  ;;  %v639_v59 = vld [vmem:[#allocation7 + $0x998] sm:$0xff] }
  0x7f   :  { %803 = vmatpush.msra.mxu2 %v503_v60  ;;  %826 = vmatpush.msra.mxu3 %v583_v61  ;;  %v469_v49 = vld [vmem:[#allocation7 + $0x448] sm:$0xff]  ;;  %v379_v60 = vld [vmem:[#allocation7 + $0x178] sm:$0xff] }
  0x80   :  { %758 = vmatpush.msra.mxu0 %v338_v52  ;;  %781 = vmatpush.msra.mxu1 %v418_v53  ;;  %v564_v52 = vld [vmem:[#allocation7 + $0x740] sm:$0xff]  ;;  %v459_v61 = vld [vmem:[#allocation7 + $0x3f8] sm:$0xff] }
  0x81   :  { %804 = vmatpush.msra.mxu2 %v498_v62  ;;  %827 = vmatpush.msra.mxu3 %v578_v63  ;;  %v644_v53 = vld [vmem:[#allocation7 + $0x9c0] sm:$0xff] }
  0x82   :  { %759 = vmatpush.msra.mxu0 %v333_v56  ;;  %782 = vmatpush.msra.mxu1 %v413_v57 }
  0x83   :  { %805 = vmatpush.msra.mxu2 %v493_v0  ;;  %828 = vmatpush.msra.mxu3 %v573_v1  ;;  %v554_v0 = vld [vmem:[#allocation7 + $0x6f0] sm:$0xff] }
  0x84   :  { %v634_v1 = vld [vmem:[#allocation7 + $0x970] sm:$0xff] }
  0xbd   :  { %v212_v8 = vpop.f32.mrf.mxu0  ;;  %v235_v9 = vpop.f32.mrf.mxu1 }
  0xbe   :  { %v297_v10 = vmul.f32 %v289_v4, %v212_v8  ;;  %v298_v11 = vmul.f32 %v290_v5, %v235_v9  ;;  %v544_v8 = vld [vmem:[#allocation7 + $0x6a0] sm:$0xff] }
  0xbf   :  { %v624_v9 = vld [vmem:[#allocation7 + $0x920] sm:$0xff] }
  0xc0   :  { %v316_v12 = vadd.f32 %v308_v6, %v297_v10  ;;  %v317_v13 = vadd.f32 %v309_v7, %v298_v11  ;;  %v364_v10 = vld [vmem:[#allocation7 + $0x100] sm:$0xff] }
  0xc1   :  { %v444_v11 = vld [vmem:[#allocation7 + $0x380] sm:$0xff] }
  0xc2   :  { %v2273_v16 = vmax.f32 %v316_v12, 0.0  ;;  %v2275_v17 = vmax.f32 %v317_v13, 0.0  ;;  %v539_v12 = vld [vmem:[#allocation7 + $0x678] sm:$0xff] }
  0xc3   :  { %v619_v13 = vld [vmem:[#allocation7 + $0x8f8] sm:$0xff] }
  0xc4   :  { %v258_v22 = vpop.f32.mrf.mxu2  ;;  %v281_v23 = vpop.f32.mrf.mxu3  ;;  %668 = vmatmul.f32.vlgmr.msrb.gmra.mxu0 %v2273_v16  ;;  %691 = vmatmul.f32.vlgmr.msrb.gmra.mxu1 %v2275_v17 }
  0xc5   :  { %v299_v26 = vmul.f32 %v291_v14, %v258_v22  ;;  %v300_v27 = vmul.f32 %v292_v15, %v281_v23  ;;  %836 = vmatpush.msrb.mxu0 %v409_v18  ;;  %859 = vmatpush.msrb.mxu1 %v489_v19  ;;  %v215_v28 = vpop.f32.mrf.mxu0  ;;  %v238_v29 = vpop.f32.mrf.mxu1  ;;  %v534_v18 = vld [vmem:[#allocation7 + $0x650] sm:$0xff]  ;;  %v529_v22 = vld [vmem:[#allocation7 + $0x628] sm:$0xff] }
  0xc6   :  { %v301_v30 = vmul.f32 %v289_v4, %v215_v28  ;;  %v302_v31 = vmul.f32 %v290_v5, %v238_v29  ;;  %v549_v4 = vld [vmem:[#allocation7 + $0x6c8] sm:$0xff]  ;;  %v614_v19 = vld [vmem:[#allocation7 + $0x8d0] sm:$0xff]  ;;  %v344_v28 = vld [vmem:[#allocation7 + $0x60] sm:$0xff] }
  0xc7   :  { %v318_v34 = vadd.f32 %v310_v20, %v299_v26  ;;  %v319_v35 = vadd.f32 %v311_v21, %v300_v27  ;;  %837 = vmatpush.msrb.mxu0 %v404_v24  ;;  %860 = vmatpush.msrb.mxu1 %v484_v25  ;;  %v629_v5 = vld [vmem:[#allocation7 + $0x948] sm:$0xff]  ;;  %v524_v26 = vld [vmem:[#allocation7 + $0x600] sm:$0xff] }
  0xc8   :  { %v320_v36 = vadd.f32 %v308_v6, %v301_v30  ;;  %v321_v37 = vadd.f32 %v309_v7, %v302_v31  ;;  %v369_v6 = vld [vmem:[#allocation7 + $0x128] sm:$0xff]  ;;  %v604_v27 = vld [vmem:[#allocation7 + $0x880] sm:$0xff]  ;;  %v519_v30 = vld [vmem:[#allocation7 + $0x5d8] sm:$0xff] }
  0xc9   :  { %v2281_v38 = vmax.f32 %v318_v34, 0.0  ;;  %v2283_v39 = vmax.f32 %v319_v35, 0.0  ;;  %838 = vmatpush.msrb.mxu0 %v399_v32  ;;  %861 = vmatpush.msrb.mxu1 %v479_v33  ;;  %v449_v7 = vld [vmem:[#allocation7 + $0x3a8] sm:$0xff]  ;;  %v424_v29 = vld [vmem:[#allocation7 + $0x2e0] sm:$0xff]  ;;  %v599_v31 = vld [vmem:[#allocation7 + $0x858] sm:$0xff] }
  0xca   :  { %v2285_v42 = vmax.f32 %v320_v36, 0.0  ;;  %v2287_v43 = vmax.f32 %v321_v37, 0.0  ;;  %v609_v23 = vld [vmem:[#allocation7 + $0x8a8] sm:$0xff]  ;;  %v339_v32 = vld [vmem:[#allocation7 + $0x38] sm:$0xff]  ;;  %v514_v34 = vld [vmem:[#allocation7 + $0x5b0] sm:$0xff] }
  0xcb   :  { %714 = vmatmul.f32.vlgmr.msrb.gmra.mxu2 %v2281_v38  ;;  %737 = vmatmul.f32.vlgmr.msrb.gmra.mxu3 %v2283_v39  ;;  %v349_v24 = vld [vmem:[#allocation7 + $0x88] sm:$0xff]  ;;  %v419_v33 = vld [vmem:[#allocation7 + $0x2b8] sm:$0xff]  ;;  %v594_v35 = vld [vmem:[#allocation7 + $0x830] sm:$0xff] }
  0xcc   :  { %839 = vmatpush.msrb.mxu0 %v394_v40  ;;  %862 = vmatpush.msrb.mxu1 %v474_v41  ;;  %v261_v46 = vpop.f32.mrf.mxu2  ;;  %v284_v47 = vpop.f32.mrf.mxu3  ;;  %v429_v25 = vld [vmem:[#allocation7 + $0x308] sm:$0xff]  ;;  %v334_v36 = vld [vmem:[#allocation7 + $0x10] sm:$0xff] }
  0xcd   :  { %882 = vmatpush.msrb.mxu2 %v569_v44  ;;  %905 = vmatpush.msrb.mxu3 %v649_v45  ;;  %v303_v50 = vmul.f32 %v291_v14, %v261_v46  ;;  %v304_v51 = vmul.f32 %v292_v15, %v284_v47  ;;  %v359_v14 = vld [vmem:[#allocation7 + $0xd8] sm:$0xff]  ;;  %v414_v37 = vld [vmem:[#allocation7 + $0x290] sm:$0xff]  ;;  %v509_v40 = vld [vmem:[#allocation7 + $0x588] sm:$0xff] }
  0xce   :  { %671 = vmatmul.f32.gmra.mxu0 %v2285_v42  ;;  %694 = vmatmul.f32.gmra.mxu1 %v2287_v43  ;;  %v439_v15 = vld [vmem:[#allocation7 + $0x358] sm:$0xff]  ;;  %v589_v41 = vld [vmem:[#allocation7 + $0x808] sm:$0xff]  ;;  %v410_v44 = vld [vmem:[#allocation7 + $0x270] sm:$0xff] }
  0xcf   :  { %v322_v56 = vadd.f32 %v310_v20, %v303_v50  ;;  %v323_v57 = vadd.f32 %v311_v21, %v304_v51  ;;  %840 = vmatpush.msrb.mxu0 %v389_v48  ;;  %863 = vmatpush.msrb.mxu1 %v469_v49  ;;  %v354_v20 = vld [vmem:[#allocation7 + $0xb0] sm:$0xff]  ;;  %v504_v46 = vld [vmem:[#allocation7 + $0x560] sm:$0xff]  ;;  %v405_v48 = vld [vmem:[#allocation7 + $0x248] sm:$0xff] }
  0xd0   :  { %883 = vmatpush.msrb.mxu2 %v564_v52  ;;  %906 = vmatpush.msrb.mxu3 %v644_v53  ;;  %v434_v21 = vld [vmem:[#allocation7 + $0x330] sm:$0xff]  ;;  %v584_v47 = vld [vmem:[#allocation7 + $0x7e0] sm:$0xff]  ;;  %v485_v49 = vld [vmem:[#allocation7 + $0x4c8] sm:$0xff] }
  0xd1   :  { %v2293_v62 = vmax.f32 %v322_v56, 0.0  ;;  %v2295_v63 = vmax.f32 %v323_v57, 0.0  ;;  %841 = vmatpush.msrb.mxu0 %v384_v54  ;;  %864 = vmatpush.msrb.mxu1 %v464_v55  ;;  %v490_v45 = vld [vmem:[#allocation7 + $0x4f0] sm:$0xff]  ;;  %v499_v50 = vld [vmem:[#allocation7 + $0x538] sm:$0xff]  ;;  %v400_v52 = vld [vmem:[#allocation7 + $0x220] sm:$0xff] }
  0xd2   :  { %884 = vmatpush.msrb.mxu2 %v559_v58  ;;  %907 = vmatpush.msrb.mxu3 %v639_v59  ;;  %v579_v51 = vld [vmem:[#allocation7 + $0x7b8] sm:$0xff]  ;;  %v480_v53 = vld [vmem:[#allocation7 + $0x4a0] sm:$0xff]  ;;  %v494_v54 = vld [vmem:[#allocation7 + $0x510] sm:$0xff] }
  0xd3   :  { %842 = vmatpush.msrb.mxu0 %v379_v60  ;;  %865 = vmatpush.msrb.mxu1 %v459_v61  ;;  %v574_v55 = vld [vmem:[#allocation7 + $0x790] sm:$0xff]  ;;  %v395_v56 = vld [vmem:[#allocation7 + $0x1f8] sm:$0xff] }
  0xd4   :  { %885 = vmatpush.msrb.mxu2 %v554_v0  ;;  %908 = vmatpush.msrb.mxu3 %v634_v1  ;;  %v475_v57 = vld [vmem:[#allocation7 + $0x478] sm:$0xff]  ;;  %v570_v58 = vld [vmem:[#allocation7 + $0x770] sm:$0xff]  ;;  %v565_v0 = vld [vmem:[#allocation7 + $0x748] sm:$0xff] }
  0xd5   :  { %717 = vmatmul.f32.gmra.mxu2 %v2293_v62  ;;  %740 = vmatmul.f32.gmra.mxu3 %v2295_v63  ;;  %v650_v59 = vld [vmem:[#allocation7 + $0x9f0] sm:$0xff]  ;;  %v645_v1 = vld [vmem:[#allocation7 + $0x9c8] sm:$0xff] }
  0xd6   :  { %843 = vmatpush.msrb.mxu0 %v374_v2  ;;  %866 = vmatpush.msrb.mxu1 %v454_v3  ;;  %v390_v60 = vld [vmem:[#allocation7 + $0x1d0] sm:$0xff]  ;;  %v385_v2 = vld [vmem:[#allocation7 + $0x1a8] sm:$0xff] }
  0xd7   :  { %886 = vmatpush.msrb.mxu2 %v549_v4  ;;  %909 = vmatpush.msrb.mxu3 %v629_v5  ;;  %v470_v61 = vld [vmem:[#allocation7 + $0x450] sm:$0xff]  ;;  %v465_v3 = vld [vmem:[#allocation7 + $0x428] sm:$0xff]  ;;  %v560_v4 = vld [vmem:[#allocation7 + $0x720] sm:$0xff] }
  0xd8   :  { %760 = vmatmul.f32.vlgmr.msra.gmra.mxu0 %v2273_v16  ;;  %783 = vmatmul.f32.vlgmr.msra.gmra.mxu1 %v2275_v17  ;;  %v640_v5 = vld [vmem:[#allocation7 + $0x9a0] sm:$0xff] }
  0xd9   :  { %844 = vmatpush.msrb.mxu0 %v369_v6  ;;  %867 = vmatpush.msrb.mxu1 %v449_v7  ;;  %v380_v6 = vld [vmem:[#allocation7 + $0x180] sm:$0xff] }
  0xda   :  { %887 = vmatpush.msrb.mxu2 %v544_v8  ;;  %910 = vmatpush.msrb.mxu3 %v624_v9  ;;  %v460_v7 = vld [vmem:[#allocation7 + $0x400] sm:$0xff]  ;;  %v555_v8 = vld [vmem:[#allocation7 + $0x6f8] sm:$0xff] }
  0xdb   :  { %845 = vmatpush.msrb.mxu0 %v364_v10  ;;  %868 = vmatpush.msrb.mxu1 %v444_v11  ;;  %v635_v9 = vld [vmem:[#allocation7 + $0x978] sm:$0xff] }
  0xdc   :  { %888 = vmatpush.msrb.mxu2 %v539_v12  ;;  %911 = vmatpush.msrb.mxu3 %v619_v13  ;;  %v375_v10 = vld [vmem:[#allocation7 + $0x158] sm:$0xff]  ;;  %v550_v12 = vld [vmem:[#allocation7 + $0x6d0] sm:$0xff] }
  0xdd   :  { %846 = vmatpush.msrb.mxu0 %v359_v14  ;;  %869 = vmatpush.msrb.mxu1 %v439_v15  ;;  %v455_v11 = vld [vmem:[#allocation7 + $0x3d8] sm:$0xff]  ;;  %v630_v13 = vld [vmem:[#allocation7 + $0x950] sm:$0xff] }
  0xde   :  { %889 = vmatpush.msrb.mxu2 %v534_v18  ;;  %912 = vmatpush.msrb.mxu3 %v614_v19  ;;  %v370_v14 = vld [vmem:[#allocation7 + $0x130] sm:$0xff]  ;;  %v545_v18 = vld [vmem:[#allocation7 + $0x6a8] sm:$0xff] }
  0xdf   :  { %806 = vmatmul.f32.vlgmr.msra.gmra.mxu2 %v2281_v38  ;;  %829 = vmatmul.f32.vlgmr.msra.gmra.mxu3 %v2283_v39  ;;  %v450_v15 = vld [vmem:[#allocation7 + $0x3b0] sm:$0xff]  ;;  %v625_v19 = vld [vmem:[#allocation7 + $0x928] sm:$0xff] }
  0xe0   :  { %847 = vmatpush.msrb.mxu0 %v354_v20  ;;  %870 = vmatpush.msrb.mxu1 %v434_v21  ;;  %v365_v20 = vld [vmem:[#allocation7 + $0x108] sm:$0xff] }
  0xe1   :  { %890 = vmatpush.msrb.mxu2 %v529_v22  ;;  %913 = vmatpush.msrb.mxu3 %v609_v23  ;;  %v445_v21 = vld [vmem:[#allocation7 + $0x388] sm:$0xff]  ;;  %v540_v22 = vld [vmem:[#allocation7 + $0x680] sm:$0xff] }
  0xe2   :  { %763 = vmatmul.f32.gmra.mxu0 %v2285_v42  ;;  %786 = vmatmul.f32.gmra.mxu1 %v2287_v43  ;;  %v620_v23 = vld [vmem:[#allocation7 + $0x900] sm:$0xff] }
  0xe3   :  { %848 = vmatpush.msrb.mxu0 %v349_v24  ;;  %871 = vmatpush.msrb.mxu1 %v429_v25  ;;  %v360_v24 = vld [vmem:[#allocation7 + $0xe0] sm:$0xff] }
  0xe4   :  { %891 = vmatpush.msrb.mxu2 %v524_v26  ;;  %914 = vmatpush.msrb.mxu3 %v604_v27  ;;  %v440_v25 = vld [vmem:[#allocation7 + $0x360] sm:$0xff]  ;;  %v535_v26 = vld [vmem:[#allocation7 + $0x658] sm:$0xff] }
  0xe5   :  { %849 = vmatpush.msrb.mxu0 %v344_v28  ;;  %872 = vmatpush.msrb.mxu1 %v424_v29  ;;  %v615_v27 = vld [vmem:[#allocation7 + $0x8d8] sm:$0xff] }
  0xe6   :  { %892 = vmatpush.msrb.mxu2 %v519_v30  ;;  %915 = vmatpush.msrb.mxu3 %v599_v31  ;;  %v355_v28 = vld [vmem:[#allocation7 + $0xb8] sm:$0xff]  ;;  %v530_v30 = vld [vmem:[#allocation7 + $0x630] sm:$0xff] }
  0xe7   :  { %850 = vmatpush.msrb.mxu0 %v339_v32  ;;  %873 = vmatpush.msrb.mxu1 %v419_v33  ;;  %v435_v29 = vld [vmem:[#allocation7 + $0x338] sm:$0xff]  ;;  %v610_v31 = vld [vmem:[#allocation7 + $0x8b0] sm:$0xff] }
  0xe8   :  { %893 = vmatpush.msrb.mxu2 %v514_v34  ;;  %916 = vmatpush.msrb.mxu3 %v594_v35  ;;  %v350_v32 = vld [vmem:[#allocation7 + $0x90] sm:$0xff]  ;;  %v525_v34 = vld [vmem:[#allocation7 + $0x608] sm:$0xff] }
  0xe9   :  { %809 = vmatmul.f32.gmra.mxu2 %v2293_v62  ;;  %832 = vmatmul.f32.gmra.mxu3 %v2295_v63  ;;  %v430_v33 = vld [vmem:[#allocation7 + $0x310] sm:$0xff]  ;;  %v605_v35 = vld [vmem:[#allocation7 + $0x888] sm:$0xff] }
  0xea   :  { %851 = vmatpush.msrb.mxu0 %v334_v36  ;;  %874 = vmatpush.msrb.mxu1 %v414_v37  ;;  %v345_v36 = vld [vmem:[#allocation7 + $0x68] sm:$0xff] }
  0xeb   :  { %894 = vmatpush.msrb.mxu2 %v509_v40  ;;  %917 = vmatpush.msrb.mxu3 %v589_v41  ;;  %v425_v37 = vld [vmem:[#allocation7 + $0x2e8] sm:$0xff]  ;;  %v520_v40 = vld [vmem:[#allocation7 + $0x5e0] sm:$0xff] }
  0xec   :  { %928 = vmatpush.msra.mxu0 %v410_v44  ;;  %951 = vmatpush.msra.mxu1 %v490_v45  ;;  %v600_v41 = vld [vmem:[#allocation7 + $0x860] sm:$0xff] }
  0xed   :  { %852 = vmatmul.f32.vlgmr.msrb.gmra.mxu0 %v2273_v16  ;;  %875 = vmatmul.f32.vlgmr.msrb.gmra.mxu1 %v2275_v17  ;;  %v340_v44 = vld [vmem:[#allocation7 + $0x40] sm:$0xff] }
  0xee   :  { %895 = vmatpush.msrb.mxu2 %v504_v46  ;;  %918 = vmatpush.msrb.mxu3 %v584_v47  ;;  %v420_v45 = vld [vmem:[#allocation7 + $0x2c0] sm:$0xff]  ;;  %v515_v46 = vld [vmem:[#allocation7 + $0x5b8] sm:$0xff] }
  0xef   :  { %929 = vmatpush.msra.mxu0 %v405_v48  ;;  %952 = vmatpush.msra.mxu1 %v485_v49  ;;  %v595_v47 = vld [vmem:[#allocation7 + $0x838] sm:$0xff] }
  0xf0   :  { %896 = vmatpush.msrb.mxu2 %v499_v50  ;;  %919 = vmatpush.msrb.mxu3 %v579_v51  ;;  %v335_v48 = vld [vmem:[#allocation7 + $0x18] sm:$0xff]  ;;  %v510_v50 = vld [vmem:[#allocation7 + $0x590] sm:$0xff] }
  0xf1   :  { %930 = vmatpush.msra.mxu0 %v400_v52  ;;  %953 = vmatpush.msra.mxu1 %v480_v53  ;;  %v415_v49 = vld [vmem:[#allocation7 + $0x298] sm:$0xff]  ;;  %v590_v51 = vld [vmem:[#allocation7 + $0x810] sm:$0xff] }
  0xf2   :  { %897 = vmatpush.msrb.mxu2 %v494_v54  ;;  %920 = vmatpush.msrb.mxu3 %v574_v55  ;;  %v411_v52 = vld [vmem:[#allocation7 + $0x278] sm:$0xff]  ;;  %v505_v54 = vld [vmem:[#allocation7 + $0x568] sm:$0xff] }
  0xf3   :  { %931 = vmatpush.msra.mxu0 %v395_v56  ;;  %954 = vmatpush.msra.mxu1 %v475_v57  ;;  %v491_v53 = vld [vmem:[#allocation7 + $0x4f8] sm:$0xff]  ;;  %v585_v55 = vld [vmem:[#allocation7 + $0x7e8] sm:$0xff]  ;;  %v406_v56 = vld [vmem:[#allocation7 + $0x250] sm:$0xff] }
  0xf4   :  { %974 = vmatpush.msra.mxu2 %v570_v58  ;;  %997 = vmatpush.msra.mxu3 %v650_v59  ;;  %v486_v57 = vld [vmem:[#allocation7 + $0x4d0] sm:$0xff]  ;;  %v500_v58 = vld [vmem:[#allocation7 + $0x540] sm:$0xff] }
  0xf5   :  { %898 = vmatmul.f32.vlgmr.msrb.gmra.mxu2 %v2281_v38  ;;  %921 = vmatmul.f32.vlgmr.msrb.gmra.mxu3 %v2283_v39  ;;  %v580_v59 = vld [vmem:[#allocation7 + $0x7c0] sm:$0xff] }
  0xf6   :  { %932 = vmatpush.msra.mxu0 %v390_v60  ;;  %955 = vmatpush.msra.mxu1 %v470_v61  ;;  %v401_v60 = vld [vmem:[#allocation7 + $0x228] sm:$0xff] }
  0xf7   :  { %975 = vmatpush.msra.mxu2 %v565_v0  ;;  %998 = vmatpush.msra.mxu3 %v645_v1  ;;  %v481_v61 = vld [vmem:[#allocation7 + $0x4a8] sm:$0xff]  ;;  %v495_v0 = vld [vmem:[#allocation7 + $0x518] sm:$0xff] }
  0xf8   :  { %855 = vmatmul.f32.gmra.mxu0 %v2285_v42  ;;  %878 = vmatmul.f32.gmra.mxu1 %v2287_v43  ;;  %v575_v1 = vld [vmem:[#allocation7 + $0x798] sm:$0xff] }
  0xf9   :  { %933 = vmatpush.msra.mxu0 %v385_v2  ;;  %956 = vmatpush.msra.mxu1 %v465_v3  ;;  %v396_v2 = vld [vmem:[#allocation7 + $0x200] sm:$0xff] }
  0xfa   :  { %976 = vmatpush.msra.mxu2 %v560_v4  ;;  %999 = vmatpush.msra.mxu3 %v640_v5  ;;  %v476_v3 = vld [vmem:[#allocation7 + $0x480] sm:$0xff]  ;;  %v571_v4 = vld [vmem:[#allocation7 + $0x778] sm:$0xff] }
  0xfb   :  { %934 = vmatpush.msra.mxu0 %v380_v6  ;;  %957 = vmatpush.msra.mxu1 %v460_v7  ;;  %v651_v5 = vld [vmem:[#allocation7 + $0x9f8] sm:$0xff] }
  0xfc   :  { %977 = vmatpush.msra.mxu2 %v555_v8  ;;  %1000 = vmatpush.msra.mxu3 %v635_v9  ;;  %v391_v6 = vld [vmem:[#allocation7 + $0x1d8] sm:$0xff]  ;;  %v566_v8 = vld [vmem:[#allocation7 + $0x750] sm:$0xff] }
  0xfd   :  { %935 = vmatpush.msra.mxu0 %v375_v10  ;;  %958 = vmatpush.msra.mxu1 %v455_v11  ;;  %v471_v7 = vld [vmem:[#allocation7 + $0x458] sm:$0xff]  ;;  %v646_v9 = vld [vmem:[#allocation7 + $0x9d0] sm:$0xff] }
  0xfe   :  { %978 = vmatpush.msra.mxu2 %v550_v12  ;;  %1001 = vmatpush.msra.mxu3 %v630_v13  ;;  %v386_v10 = vld [vmem:[#allocation7 + $0x1b0] sm:$0xff]  ;;  %v561_v12 = vld [vmem:[#allocation7 + $0x728] sm:$0xff] }
  0xff   :  { %901 = vmatmul.f32.gmra.mxu2 %v2293_v62  ;;  %924 = vmatmul.f32.gmra.mxu3 %v2295_v63  ;;  %v466_v11 = vld [vmem:[#allocation7 + $0x430] sm:$0xff]  ;;  %v641_v13 = vld [vmem:[#allocation7 + $0x9a8] sm:$0xff] }
 0x100   :  { %936 = vmatpush.msra.mxu0 %v370_v14  ;;  %959 = vmatpush.msra.mxu1 %v450_v15  ;;  %v381_v14 = vld [vmem:[#allocation7 + $0x188] sm:$0xff] }
 0x101   :  { %979 = vmatpush.msra.mxu2 %v545_v18  ;;  %1002 = vmatpush.msra.mxu3 %v625_v19  ;;  %v461_v15 = vld [vmem:[#allocation7 + $0x408] sm:$0xff]  ;;  %v556_v18 = vld [vmem:[#allocation7 + $0x700] sm:$0xff] }
 0x102   :  { %937 = vmatpush.msra.mxu0 %v365_v20  ;;  %960 = vmatpush.msra.mxu1 %v445_v21  ;;  %v636_v19 = vld [vmem:[#allocation7 + $0x980] sm:$0xff] }
 0x103   :  { %980 = vmatpush.msra.mxu2 %v540_v22  ;;  %1003 = vmatpush.msra.mxu3 %v620_v23  ;;  %v376_v20 = vld [vmem:[#allocation7 + $0x160] sm:$0xff]  ;;  %v551_v22 = vld [vmem:[#allocation7 + $0x6d8] sm:$0xff] }
 0x104   :  { %938 = vmatpush.msra.mxu0 %v360_v24  ;;  %961 = vmatpush.msra.mxu1 %v440_v25  ;;  %v456_v21 = vld [vmem:[#allocation7 + $0x3e0] sm:$0xff]  ;;  %v631_v23 = vld [vmem:[#allocation7 + $0x958] sm:$0xff] }
 0x105   :  { %981 = vmatpush.msra.mxu2 %v535_v26  ;;  %1004 = vmatpush.msra.mxu3 %v615_v27  ;;  %v371_v24 = vld [vmem:[#allocation7 + $0x138] sm:$0xff]  ;;  %v546_v26 = vld [vmem:[#allocation7 + $0x6b0] sm:$0xff] }
 0x106   :  { %939 = vmatpush.msra.mxu0 %v355_v28  ;;  %962 = vmatpush.msra.mxu1 %v435_v29  ;;  %v451_v25 = vld [vmem:[#allocation7 + $0x3b8] sm:$0xff]  ;;  %v626_v27 = vld [vmem:[#allocation7 + $0x930] sm:$0xff] }
 0x107   :  { %982 = vmatpush.msra.mxu2 %v530_v30  ;;  %1005 = vmatpush.msra.mxu3 %v610_v31  ;;  %v366_v28 = vld [vmem:[#allocation7 + $0x110] sm:$0xff]  ;;  %v541_v30 = vld [vmem:[#allocation7 + $0x688] sm:$0xff] }
 0x108   :  { %940 = vmatpush.msra.mxu0 %v350_v32  ;;  %963 = vmatpush.msra.mxu1 %v430_v33  ;;  %v446_v29 = vld [vmem:[#allocation7 + $0x390] sm:$0xff]  ;;  %v621_v31 = vld [vmem:[#allocation7 + $0x908] sm:$0xff] }
 0x109   :  { %983 = vmatpush.msra.mxu2 %v525_v34  ;;  %1006 = vmatpush.msra.mxu3 %v605_v35  ;;  %v361_v32 = vld [vmem:[#allocation7 + $0xe8] sm:$0xff]  ;;  %v536_v34 = vld [vmem:[#allocation7 + $0x660] sm:$0xff] }
 0x10a   :  { %941 = vmatpush.msra.mxu0 %v345_v36  ;;  %964 = vmatpush.msra.mxu1 %v425_v37  ;;  %v441_v33 = vld [vmem:[#allocation7 + $0x368] sm:$0xff]  ;;  %v616_v35 = vld [vmem:[#allocation7 + $0x8e0] sm:$0xff] }
 0x10b   :  { %984 = vmatpush.msra.mxu2 %v520_v40  ;;  %1007 = vmatpush.msra.mxu3 %v600_v41  ;;  %v356_v36 = vld [vmem:[#allocation7 + $0xc0] sm:$0xff]  ;;  %v531_v40 = vld [vmem:[#allocation7 + $0x638] sm:$0xff] }
 0x10c   :  { %942 = vmatpush.msra.mxu0 %v340_v44  ;;  %965 = vmatpush.msra.mxu1 %v420_v45  ;;  %v436_v37 = vld [vmem:[#allocation7 + $0x340] sm:$0xff]  ;;  %v611_v41 = vld [vmem:[#allocation7 + $0x8b8] sm:$0xff] }
 0x10d   :  { %985 = vmatpush.msra.mxu2 %v515_v46  ;;  %1008 = vmatpush.msra.mxu3 %v595_v47  ;;  %v351_v44 = vld [vmem:[#allocation7 + $0x98] sm:$0xff]  ;;  %v526_v46 = vld [vmem:[#allocation7 + $0x610] sm:$0xff] }
 0x10e   :  { %943 = vmatpush.msra.mxu0 %v335_v48  ;;  %966 = vmatpush.msra.mxu1 %v415_v49  ;;  %v431_v45 = vld [vmem:[#allocation7 + $0x318] sm:$0xff]  ;;  %v606_v47 = vld [vmem:[#allocation7 + $0x890] sm:$0xff] }
 0x10f   :  { %986 = vmatpush.msra.mxu2 %v510_v50  ;;  %1009 = vmatpush.msra.mxu3 %v590_v51  ;;  %v346_v48 = vld [vmem:[#allocation7 + $0x70] sm:$0xff]  ;;  %v521_v50 = vld [vmem:[#allocation7 + $0x5e8] sm:$0xff] }
 0x110   :  { %944 = vmatmul.f32.vlgmr.msra.gmra.mxu0 %v2273_v16  ;;  %967 = vmatmul.f32.vlgmr.msra.gmra.mxu1 %v2275_v17  ;;  %v426_v49 = vld [vmem:[#allocation7 + $0x2f0] sm:$0xff]  ;;  %v601_v51 = vld [vmem:[#allocation7 + $0x868] sm:$0xff] }
 0x111   :  { %1020 = vmatpush.msrb.mxu0 %v411_v52  ;;  %1043 = vmatpush.msrb.mxu1 %v491_v53  ;;  %v341_v52 = vld [vmem:[#allocation7 + $0x48] sm:$0xff] }
 0x112   :  { %987 = vmatpush.msra.mxu2 %v505_v54  ;;  %1010 = vmatpush.msra.mxu3 %v585_v55  ;;  %v421_v53 = vld [vmem:[#allocation7 + $0x2c8] sm:$0xff]  ;;  %v516_v54 = vld [vmem:[#allocation7 + $0x5c0] sm:$0xff] }
 0x113   :  { %1021 = vmatpush.msrb.mxu0 %v406_v56  ;;  %1044 = vmatpush.msrb.mxu1 %v486_v57  ;;  %v596_v55 = vld [vmem:[#allocation7 + $0x840] sm:$0xff] }
 0x114   :  { %988 = vmatpush.msra.mxu2 %v500_v58  ;;  %1011 = vmatpush.msra.mxu3 %v580_v59  ;;  %v336_v56 = vld [vmem:[#allocation7 + $0x20] sm:$0xff]  ;;  %v511_v58 = vld [vmem:[#allocation7 + $0x598] sm:$0xff] }
 0x115   :  { %1022 = vmatpush.msrb.mxu0 %v401_v60  ;;  %1045 = vmatpush.msrb.mxu1 %v481_v61  ;;  %v416_v57 = vld [vmem:[#allocation7 + $0x2a0] sm:$0xff]  ;;  %v591_v59 = vld [vmem:[#allocation7 + $0x818] sm:$0xff]  ;;  %v506_v60 = vld [vmem:[#allocation7 + $0x570] sm:$0xff] }
 0x116   :  { %989 = vmatpush.msra.mxu2 %v495_v0  ;;  %1012 = vmatpush.msra.mxu3 %v575_v1  ;;  %v586_v61 = vld [vmem:[#allocation7 + $0x7f0] sm:$0xff] }
 0x117   :  { %990 = vmatmul.f32.vlgmr.msra.gmra.mxu2 %v2281_v38  ;;  %1013 = vmatmul.f32.vlgmr.msra.gmra.mxu3 %v2283_v39  ;;  %v1227_v0 = vld [vmem:[#allocation10 + $0x1e0] sm:$0xff] }
 0x118   :  { %1023 = vmatpush.msrb.mxu0 %v396_v2  ;;  %1046 = vmatpush.msrb.mxu1 %v476_v3  ;;  %v1291_v1 = vld [vmem:[#allocation10 + $0x3e0] sm:$0xff] }
 0x119   :  { %1066 = vmatpush.msrb.mxu2 %v571_v4  ;;  %1089 = vmatpush.msrb.mxu3 %v651_v5  ;;  %v501_v2 = vld [vmem:[#allocation7 + $0x548] sm:$0xff] }
 0x11a   :  { %947 = vmatmul.f32.gmra.mxu0 %v2285_v42  ;;  %970 = vmatmul.f32.gmra.mxu1 %v2287_v43  ;;  %v581_v3 = vld [vmem:[#allocation7 + $0x7c8] sm:$0xff] }
 0x11b   :  { %1024 = vmatpush.msrb.mxu0 %v391_v6  ;;  %1047 = vmatpush.msrb.mxu1 %v471_v7  ;;  %v1223_v4 = vld [vmem:[#allocation10 + $0x1c0] sm:$0xff]  ;;  %v496_v6 = vld [vmem:[#allocation7 + $0x520] sm:$0xff] }
 0x11c   :  { %1067 = vmatpush.msrb.mxu2 %v566_v8  ;;  %1090 = vmatpush.msrb.mxu3 %v646_v9  ;;  %v1287_v5 = vld [vmem:[#allocation10 + $0x3c0] sm:$0xff]  ;;  %v576_v7 = vld [vmem:[#allocation7 + $0x7a0] sm:$0xff] }
 0x11d   :  { %1025 = vmatpush.msrb.mxu0 %v386_v10  ;;  %1048 = vmatpush.msrb.mxu1 %v466_v11  ;;  %v1355_v8 = vld [vmem:[#allocation10 + $0x5e0] sm:$0xff] }
 0x11e   :  { %1068 = vmatpush.msrb.mxu2 %v561_v12  ;;  %1091 = vmatpush.msrb.mxu3 %v641_v13  ;;  %v1219_v9 = vld [vmem:[#allocation10 + $0x1a0] sm:$0xff] }
 0x11f   :  { %1026 = vmatpush.msrb.mxu0 %v381_v14  ;;  %1049 = vmatpush.msrb.mxu1 %v461_v15  ;;  %v1215_v10 = vld [vmem:[#allocation10 + $0x180] sm:$0xff] }
 0x120   :  { %1069 = vmatpush.msrb.mxu2 %v556_v18  ;;  %1092 = vmatpush.msrb.mxu3 %v636_v19  ;;  %v1347_v11 = vld [vmem:[#allocation10 + $0x5a0] sm:$0xff] }
 0x121   :  { %993 = vmatmul.f32.gmra.mxu2 %v2293_v62  ;;  %1016 = vmatmul.f32.gmra.mxu3 %v2295_v63  ;;  %v1279_v12 = vld [vmem:[#allocation10 + $0x380] sm:$0xff] }
 0x122   :  { %1027 = vmatpush.msrb.mxu0 %v376_v20  ;;  %1050 = vmatpush.msrb.mxu1 %v456_v21  ;;  %v1211_v13 = vld [vmem:[#allocation10 + $0x160] sm:$0xff] }
 0x123   :  { %1070 = vmatpush.msrb.mxu2 %v551_v22  ;;  %1093 = vmatpush.msrb.mxu3 %v631_v23  ;;  %v1343_v14 = vld [vmem:[#allocation10 + $0x580] sm:$0xff] }
 0x124   :  { %1028 = vmatpush.msrb.mxu0 %v371_v24  ;;  %1051 = vmatpush.msrb.mxu1 %v451_v25  ;;  %v1275_v15 = vld [vmem:[#allocation10 + $0x360] sm:$0xff] }
 0x125   :  { %1071 = vmatpush.msrb.mxu2 %v546_v26  ;;  %1094 = vmatpush.msrb.mxu3 %v626_v27  ;;  %v1271_v18 = vld [vmem:[#allocation10 + $0x340] sm:$0xff] }
 0x126   :  { %1029 = vmatpush.msrb.mxu0 %v366_v28  ;;  %1052 = vmatpush.msrb.mxu1 %v446_v29  ;;  %v1267_v19 = vld [vmem:[#allocation10 + $0x320] sm:$0xff] }
 0x127   :  { %1072 = vmatpush.msrb.mxu2 %v541_v30  ;;  %1095 = vmatpush.msrb.mxu3 %v621_v31  ;;  %v1419_v20 = vld [vmem:[#allocation10 + $0x7e0] sm:$0xff] }
 0x128   :  { %1030 = vmatpush.msrb.mxu0 %v361_v32  ;;  %1053 = vmatpush.msrb.mxu1 %v441_v33  ;;  %v1331_v21 = vld [vmem:[#allocation10 + $0x520] sm:$0xff] }
 0x129   :  { %1073 = vmatpush.msrb.mxu2 %v536_v34  ;;  %1096 = vmatpush.msrb.mxu3 %v616_v35  ;;  %v1199_v22 = vld [vmem:[#allocation10 + $0x100] sm:$0xff]  ;;  %v2331_v35 = vld [vmem:[#allocation9] ss:$2 sm:$0x1f] }
 0x12a   :  { %1031 = vmatpush.msrb.mxu0 %v356_v36  ;;  %1054 = vmatpush.msrb.mxu1 %v436_v37  ;;  %v1415_v23 = vld [vmem:[#allocation10 + $0x7c0] sm:$0xff] }
 0x12b   :  { %1074 = vmatpush.msrb.mxu2 %v531_v40  ;;  %1097 = vmatpush.msrb.mxu3 %v611_v41  ;;  %v1263_v24 = vld [vmem:[#allocation10 + $0x300] sm:$0xff] }
 0x12c   :  { %1032 = vmatpush.msrb.mxu0 %v351_v44  ;;  %1055 = vmatpush.msrb.mxu1 %v431_v45  ;;  %v1411_v25 = vld [vmem:[#allocation10 + $0x7a0] sm:$0xff] }
 0x12d   :  { %1075 = vmatpush.msrb.mxu2 %v526_v46  ;;  %1098 = vmatpush.msrb.mxu3 %v606_v47  ;;  %v1327_v26 = vld [vmem:[#allocation10 + $0x500] sm:$0xff] }
 0x12e   :  { %1033 = vmatpush.msrb.mxu0 %v346_v48  ;;  %1056 = vmatpush.msrb.mxu1 %v426_v49  ;;  %v1323_v27 = vld [vmem:[#allocation10 + $0x4e0] sm:$0xff]  ;;  %v2333_v48 = vld [vmem:[#allocation9 + $0x1] ss:$2 sm:$0x1f] }
 0x12f   :  { %1076 = vmatpush.msrb.mxu2 %v521_v50  ;;  %1099 = vmatpush.msrb.mxu3 %v601_v51  ;;  %v1191_v28 = vld [vmem:[#allocation10 + $0xc0] sm:$0xff] }
 0x130   :  { %1034 = vmatpush.msrb.mxu0 %v341_v52  ;;  %1057 = vmatpush.msrb.mxu1 %v421_v53  ;;  %v1255_v29 = vld [vmem:[#allocation10 + $0x2c0] sm:$0xff]  ;;  %v1114_v52 = vperm.slane %v2331_v35, 0 }
 0x131   :  { %1077 = vmatpush.msrb.mxu2 %v516_v54  ;;  %1100 = vmatpush.msrb.mxu3 %v596_v55  ;;  %v1319_v32 = vld [vmem:[#allocation10 + $0x4c0] sm:$0xff] }
 0x132   :  { %1035 = vmatpush.msrb.mxu0 %v336_v56  ;;  %1058 = vmatpush.msrb.mxu1 %v416_v57  ;;  %v1187_v33 = vld [vmem:[#allocation10 + $0xa0] sm:$0xff] }
 0x133   :  { %1078 = vmatpush.msrb.mxu2 %v511_v58  ;;  %1101 = vmatpush.msrb.mxu3 %v591_v59  ;;  %v1251_v36 = vld [vmem:[#allocation10 + $0x2a0] sm:$0xff]  ;;  %v1137_v59 = vperm.slane %v2333_v48, 0 }
 0x134   :  { %1036 = vmatmul.f32.vlgmr.msrb.gmra.mxu0 %v2273_v16  ;;  %1059 = vmatmul.f32.vlgmr.msrb.gmra.mxu1 %v2275_v17  ;;  %v1351_v16 = vld [vmem:[#allocation10 + $0x5c0] sm:$0xff] }
 0x135   :  { %1079 = vmatpush.msrb.mxu2 %v506_v60  ;;  %1102 = vmatpush.msrb.mxu3 %v586_v61  ;;  %v1283_v17 = vld [vmem:[#allocation10 + $0x3a0] sm:$0xff] }
 0x136   :  { %1487 = vmatpush.msra.mxu0 %v1227_v0  ;;  %1510 = vmatpush.msra.mxu1 %v1291_v1  ;;  %v1407_v37 = vld [vmem:[#allocation10 + $0x780] sm:$0xff] }
 0x137   :  { %1080 = vmatpush.msrb.mxu2 %v501_v2  ;;  %1103 = vmatpush.msrb.mxu3 %v581_v3  ;;  %v1315_v40 = vld [vmem:[#allocation10 + $0x4a0] sm:$0xff] }
 0x138   :  { %1488 = vmatpush.msra.mxu0 %v1223_v4  ;;  %1511 = vmatpush.msra.mxu1 %v1287_v5  ;;  %v1183_v41 = vld [vmem:[#allocation10 + $0x80] sm:$0xff] }
 0x139   :  { %1081 = vmatpush.msrb.mxu2 %v496_v6  ;;  %1104 = vmatpush.msrb.mxu3 %v576_v7  ;;  %v1403_v44 = vld [vmem:[#allocation10 + $0x760] sm:$0xff] }
 0x13a   :  { %1082 = vmatmul.f32.vlgmr.msrb.gmra.mxu2 %v2281_v38  ;;  %1105 = vmatmul.f32.vlgmr.msrb.gmra.mxu3 %v2283_v39  ;;  %v1339_v38 = vld [vmem:[#allocation10 + $0x560] sm:$0xff] }
 0x13b   :  { %1533 = vmatpush.msra.mxu2 %v1355_v8  ;;  %1489 = vmatpush.msra.mxu0 %v1219_v9  ;;  %v1207_v39 = vld [vmem:[#allocation10 + $0x140] sm:$0xff] }
 0x13c   :  { %1039 = vmatmul.f32.gmra.mxu0 %v2285_v42  ;;  %1062 = vmatmul.f32.gmra.mxu1 %v2287_v43  ;;  %v1335_v42 = vld [vmem:[#allocation10 + $0x540] sm:$0xff] }
 0x13d   :  { %1534 = vmatpush.msra.mxu2 %v1351_v16  ;;  %1512 = vmatpush.msra.mxu1 %v1283_v17  ;;  %v1203_v43 = vld [vmem:[#allocation10 + $0x120] sm:$0xff] }
 0x13e   :  { %1490 = vmatpush.msra.mxu0 %v1215_v10  ;;  %1556 = vmatpush.msra.mxu3 %v1419_v20  ;;  %v1247_v45 = vld [vmem:[#allocation10 + $0x280] sm:$0xff]  ;;  %v1220_v20 = vld [vmem:[#allocation10 + $0x1a8] sm:$0xff] }
 0x13f   :  { %1535 = vmatpush.msra.mxu2 %v1347_v11  ;;  %1513 = vmatpush.msra.mxu1 %v1279_v12  ;;  %v1399_v46 = vld [vmem:[#allocation10 + $0x740] sm:$0xff]  ;;  %v1228_v12 = vld [vmem:[#allocation10 + $0x1e8] sm:$0xff] }
 0x140   :  { %1491 = vmatpush.msra.mxu0 %v1211_v13  ;;  %1557 = vmatpush.msra.mxu3 %v1415_v23  ;;  %v1311_v49 = vld [vmem:[#allocation10 + $0x480] sm:$0xff]  ;;  %v1292_v13 = vld [vmem:[#allocation10 + $0x3e8] sm:$0xff] }
 0x141   :  { %1536 = vmatpush.msra.mxu2 %v1343_v14  ;;  %1514 = vmatpush.msra.mxu1 %v1275_v15  ;;  %v669_v30 = vpop.f32.mrf.mxu0  ;;  %v692_v31 = vpop.f32.mrf.mxu1  ;;  %v1179_v50 = vld [vmem:[#allocation10 + $0x60] sm:$0xff]  ;;  %v1216_v23 = vld [vmem:[#allocation10 + $0x188] sm:$0xff] }
 0x142   :  { %1085 = vmatmul.f32.gmra.mxu2 %v2293_v62  ;;  %1108 = vmatmul.f32.gmra.mxu3 %v2295_v63  ;;  %v1195_v62 = vld [vmem:[#allocation10 + $0xe0] sm:$0xff]  ;;  %v693_v34 = vadd.f32 %v692_v31, %v669_v30  ;;  %v1208_v31 = vld [vmem:[#allocation10 + $0x148] sm:$0xff] }
 0x143   :  { %1537 = vmatpush.msra.mxu2 %v1339_v38  ;;  %1492 = vmatpush.msra.mxu0 %v1207_v39  ;;  %v1259_v63 = vld [vmem:[#allocation10 + $0x2e0] sm:$0xff]  ;;  %v1224_v39 = vld [vmem:[#allocation10 + $0x1c8] sm:$0xff] }
 0x144   :  { %1515 = vmatpush.msra.mxu1 %v1271_v18  ;;  %1558 = vmatpush.msra.mxu3 %v1411_v25  ;;  %v1243_v53 = vld [vmem:[#allocation10 + $0x260] sm:$0xff]  ;;  %v1288_v18 = vld [vmem:[#allocation10 + $0x3c8] sm:$0xff] }
 0x145   :  { %1538 = vmatpush.msra.mxu2 %v1335_v42  ;;  %1493 = vmatpush.msra.mxu0 %v1203_v43  ;;  %v1395_v54 = vld [vmem:[#allocation10 + $0x720] sm:$0xff] }
 0x146   :  { %1516 = vmatpush.msra.mxu1 %v1267_v19  ;;  %1559 = vmatpush.msra.mxu3 %v1407_v37  ;;  %v1307_v56 = vld [vmem:[#allocation10 + $0x460] sm:$0xff] }
 0x147   :  { %1539 = vmatpush.msra.mxu2 %v1331_v21  ;;  %1494 = vmatpush.msra.mxu0 %v1199_v22  ;;  %v1175_v57 = vld [vmem:[#allocation10 + $0x40] sm:$0xff]  ;;  %v1284_v21 = vld [vmem:[#allocation10 + $0x3a8] sm:$0xff] }
 0x148   :  { %1517 = vmatpush.msra.mxu1 %v1263_v24  ;;  %1560 = vmatpush.msra.mxu3 %v1403_v44  ;;  %v1239_v60 = vld [vmem:[#allocation10 + $0x240] sm:$0xff]  ;;  %v1280_v24 = vld [vmem:[#allocation10 + $0x388] sm:$0xff] }
 0x149   :  { %1540 = vmatpush.msra.mxu2 %v1327_v26  ;;  %1495 = vmatpush.msra.mxu0 %v1195_v62  ;;  %v1303_v61 = vld [vmem:[#allocation10 + $0x440] sm:$0xff]  ;;  %v1268_v44 = vld [vmem:[#allocation10 + $0x328] sm:$0xff] }
 0x14a   :  { %1518 = vmatpush.msra.mxu1 %v1259_v63  ;;  %1561 = vmatpush.msra.mxu3 %v1399_v46  ;;  %v1171_v0 = vld [vmem:[#allocation10 + $0x20] sm:$0xff]  ;;  %v1212_v63 = vld [vmem:[#allocation10 + $0x168] sm:$0xff] }
 0x14b   :  { %1541 = vmatpush.msra.mxu2 %v1323_v27  ;;  %1496 = vmatpush.msra.mxu0 %v1191_v28  ;;  %v1235_v2 = vld [vmem:[#allocation10 + $0x220] sm:$0xff]  ;;  %v672_v3 = vpop.f32.mrf.mxu0  ;;  %v695_v4 = vpop.f32.mrf.mxu1  ;;  %v1276_v27 = vld [vmem:[#allocation10 + $0x368] sm:$0xff] }
 0x14c   :  { %1519 = vmatpush.msra.mxu1 %v1255_v29  ;;  %1562 = vmatpush.msra.mxu3 %v1395_v54  ;;  %v1299_v5 = vld [vmem:[#allocation10 + $0x420] sm:$0xff]  ;;  %v696_v7 = vadd.f32 %v695_v4, %v672_v3  ;;  %v1260_v54 = vld [vmem:[#allocation10 + $0x2e8] sm:$0xff] }
 0x14d   :  { %1542 = vmatpush.msra.mxu2 %v1319_v32  ;;  %1497 = vmatpush.msra.mxu0 %v1187_v33  ;;  %v1167_v6 = vld [vmem:[#allocation10] sm:$0xff]  ;;  %v1272_v32 = vld [vmem:[#allocation10 + $0x348] sm:$0xff] }
 0x14e   :  { %v715_v47 = vpop.f32.mrf.mxu2  ;;  %1520 = vmatpush.msra.mxu1 %v1251_v36  ;;  %v738_v55 = vpop.f32.mrf.mxu3  ;;  %v1231_v9 = vld [vmem:[#allocation10 + $0x200] sm:$0xff]  ;;  %v1188_v3 = vld [vmem:[#allocation10 + $0xa8] sm:$0xff] }
 0x14f   :  { %v716_v51 = vadd.f32 %v715_v47, %v693_v34  ;;  %1543 = vmatpush.msra.mxu2 %v1315_v40  ;;  %1498 = vmatpush.msra.mxu0 %v1183_v41  ;;  %v1391_v16 = vld [vmem:[#allocation10 + $0x700] sm:$0xff]  ;;  %v1115_v40 = vperm.slane %v2331_v35, 1  ;;  %v1204_v41 = vld [vmem:[#allocation10 + $0x128] sm:$0xff] }
 0x150   :  { %1521 = vmatpush.msra.mxu1 %v1247_v45  ;;  %v1295_v17 = vld [vmem:[#allocation10 + $0x400] sm:$0xff]  ;;  %1563 = vmatpush.msra.mxu3 %v1391_v16  ;;  %v1252_v4 = vld [vmem:[#allocation10 + $0x2a8] sm:$0xff] }
 0x151   :  { %v739_v58 = vadd.f32 %v738_v55, %v716_v51  ;;  %1544 = vmatpush.msra.mxu2 %v1311_v49  ;;  %1499 = vmatpush.msra.mxu0 %v1179_v50  ;;  %v1387_v10 = vld [vmem:[#allocation10 + $0x6e0] sm:$0xff]  ;;  %v1138_v49 = vperm.slane %v2333_v48, 1  ;;  %v1200_v50 = vld [vmem:[#allocation10 + $0x108] sm:$0xff] }
 0x152   :  { %1522 = vmatpush.msra.mxu1 %v1243_v53  ;;  %1564 = vmatpush.msra.mxu3 %v1387_v10  ;;  %v1383_v15 = vld [vmem:[#allocation10 + $0x6c0] sm:$0xff]  ;;  %v1264_v51 = vld [vmem:[#allocation10 + $0x308] sm:$0xff] }
 0x153   :  { %v1124_v1 = vmul.f32 %v1114_v52, %v739_v58  ;;  %1545 = vmatpush.msra.mxu2 %v1307_v56  ;;  %1500 = vmatpush.msra.mxu0 %v1175_v57  ;;  %v1379_v43 = vld [vmem:[#allocation10 + $0x6a0] sm:$0xff]  ;;  %v1196_v53 = vld [vmem:[#allocation10 + $0xe8] sm:$0xff] }
 0x154   :  { %1523 = vmatpush.msra.mxu1 %v1239_v60  ;;  %1565 = vmatpush.msra.mxu3 %v1383_v15  ;;  %v1375_v28 = vld [vmem:[#allocation10 + $0x680] sm:$0xff]  ;;  %v1192_v57 = vld [vmem:[#allocation10 + $0xc8] sm:$0xff] }
 0x155   :  { %v1147_v8 = vadd.f32 %v1137_v59, %v1124_v1  ;;  %1546 = vmatpush.msra.mxu2 %v1303_v61  ;;  %1501 = vmatpush.msra.mxu0 %v1171_v0  ;;  %v761_v25 = vpop.f32.mrf.mxu0  ;;  %v784_v26 = vpop.f32.mrf.mxu1  ;;  %v1371_v33 = vld [vmem:[#allocation10 + $0x660] sm:$0xff]  ;;  %v1256_v58 = vld [vmem:[#allocation10 + $0x2c8] sm:$0xff] }
 0x156   :  { %1524 = vmatpush.msra.mxu1 %v1235_v2  ;;  %1566 = vmatpush.msra.mxu3 %v1379_v43  ;;  %v785_v29 = vadd.f32 %v784_v26, %v761_v25  ;;  %v1367_v36 = vld [vmem:[#allocation10 + $0x640] sm:$0xff]  ;;  %v1356_v0 = vld [vmem:[#allocation10 + $0x5e8] sm:$0xff] }
 0x157   :  { %v2337_v11 = vmax.f32 %v1147_v8, 0.0  ;;  %1547 = vmatpush.msra.mxu2 %v1299_v5  ;;  %1502 = vmatpush.msra.mxu0 %v1167_v6  ;;  %v1363_v46 = vld [vmem:[#allocation10 + $0x620] sm:$0xff]  ;;  %v1184_v16 = vld [vmem:[#allocation10 + $0x88] sm:$0xff] }
 0x158   :  { %v718_v14 = vpop.f32.mrf.mxu2  ;;  %1525 = vmatpush.msra.mxu1 %v1231_v9  ;;  %v741_v42 = vpop.f32.mrf.mxu3  ;;  %1567 = vmatpush.msra.mxu3 %v1375_v28  ;;  %v1359_v55 = vld [vmem:[#allocation10 + $0x600] sm:$0xff]  ;;  %v1180_v15 = vld [vmem:[#allocation10 + $0x68] sm:$0xff] }
 0x159   :  { %v719_v38 = vadd.f32 %v718_v14, %v696_v7  ;;  %1503 = vmatmul.f32.vlgmr.msra.gmra.mxu0 %v2337_v11  ;;  %1548 = vmatpush.msra.mxu2 %v1295_v17  ;;  %v1479_v5 = vld [vmem:[#allocation10 + $0x9c0] sm:$0xff]  ;;  %v1352_v7 = vld [vmem:[#allocation10 + $0x5c8] sm:$0xff] }
 0x15a   :  { %1602 = vmatpush.msrb.mxu1 %v1228_v12  ;;  %1568 = vmatpush.msra.mxu3 %v1371_v33  ;;  %v1475_v8 = vld [vmem:[#allocation10 + $0x9a0] sm:$0xff]  ;;  %v1248_v17 = vld [vmem:[#allocation10 + $0x288] sm:$0xff] }
 0x15b   :  { %1625 = vmatpush.msrb.mxu2 %v1292_v13  ;;  %v742_v19 = vadd.f32 %v741_v42, %v719_v38  ;;  %v1348_v12 = vld [vmem:[#allocation10 + $0x5a8] sm:$0xff]  ;;  %v1471_v13 = vld [vmem:[#allocation10 + $0x980] sm:$0xff] }
 0x15c   :  { %1603 = vmatpush.msrb.mxu1 %v1224_v39  ;;  %1569 = vmatpush.msra.mxu3 %v1367_v36  ;;  %v1244_v38 = vld [vmem:[#allocation10 + $0x268] sm:$0xff] }
 0x15d   :  { %1626 = vmatpush.msrb.mxu2 %v1288_v18  ;;  %v1129_v22 = vmul.f32 %v1114_v52, %v742_v19  ;;  %v1344_v39 = vld [vmem:[#allocation10 + $0x588] sm:$0xff]  ;;  %v1467_v18 = vld [vmem:[#allocation10 + $0x960] sm:$0xff] }
 0x15e   :  { %1604 = vmatpush.msrb.mxu1 %v1220_v20  ;;  %1570 = vmatpush.msra.mxu3 %v1363_v46  ;;  %v1176_v43 = vld [vmem:[#allocation10 + $0x48] sm:$0xff] }
 0x15f   :  { %1627 = vmatpush.msrb.mxu2 %v1284_v21  ;;  %v1152_v62 = vadd.f32 %v1137_v59, %v1129_v22  ;;  %v1483_v59 = vld [vmem:[#allocation10 + $0x9e0] sm:$0xff]  ;;  %v764_v60 = vpop.f32.mrf.mxu0  ;;  %v787_v61 = vpop.f32.mrf.mxu1  ;;  %v1240_v19 = vld [vmem:[#allocation10 + $0x248] sm:$0xff] }
 0x160   :  { %1605 = vmatpush.msrb.mxu1 %v1216_v23  ;;  %1571 = vmatpush.msra.mxu3 %v1359_v55  ;;  %v788_v1 = vadd.f32 %v787_v61, %v764_v60  ;;  %v1340_v20 = vld [vmem:[#allocation10 + $0x568] sm:$0xff]  ;;  %v1463_v21 = vld [vmem:[#allocation10 + $0x940] sm:$0xff] }
 0x161   :  { %1628 = vmatpush.msrb.mxu2 %v1280_v24  ;;  %v2340_v30 = vmax.f32 %v1152_v62, 0.0  ;;  %1579 = vmatpush.msrb.mxu0 %v1483_v59  ;;  %v1172_v23 = vld [vmem:[#allocation10 + $0x28] sm:$0xff] }
 0x162   :  { %v807_v34 = vpop.f32.mrf.mxu2  ;;  %1606 = vmatpush.msrb.mxu1 %v1212_v63  ;;  %v830_v45 = vpop.f32.mrf.mxu3  ;;  %1648 = vmatpush.msrb.mxu3 %v1356_v0  ;;  %v1236_v24 = vld [vmem:[#allocation10 + $0x228] sm:$0xff]  ;;  %v1439_v0 = vld [vmem:[#allocation10 + $0x880] sm:$0xff] }
 0x163   :  { %1629 = vmatpush.msrb.mxu2 %v1276_v27  ;;  %v808_v37 = vadd.f32 %v807_v34, %v785_v29  ;;  %1506 = vmatmul.f32.gmra.mxu0 %v2340_v30  ;;  %v1336_v62 = vld [vmem:[#allocation10 + $0x548] sm:$0xff] }
 0x164   :  { %1607 = vmatpush.msrb.mxu1 %v1208_v31  ;;  %1580 = vmatpush.msrb.mxu0 %v1479_v5  ;;  %v1168_v27 = vld [vmem:[#allocation10 + $0x8] sm:$0xff]  ;;  %v1459_v31 = vld [vmem:[#allocation10 + $0x920] sm:$0xff] }
 0x165   :  { %1630 = vmatpush.msrb.mxu2 %v1272_v32  ;;  %v831_v47 = vadd.f32 %v830_v45, %v808_v37  ;;  %1649 = vmatpush.msrb.mxu3 %v1352_v7  ;;  %v1232_v28 = vld [vmem:[#allocation10 + $0x208] sm:$0xff]  ;;  %v1455_v37 = vld [vmem:[#allocation10 + $0x900] sm:$0xff] }
 0x166   :  { %1608 = vmatpush.msrb.mxu1 %v1204_v41  ;;  %1581 = vmatpush.msrb.mxu0 %v1475_v8  ;;  %v1484_v29 = vld [vmem:[#allocation10 + $0x9e8] sm:$0xff]  ;;  %v1116_v41 = vperm.slane %v2331_v35, 2  ;;  %v1435_v8 = vld [vmem:[#allocation10 + $0x860] sm:$0xff] }
 0x167   :  { %1631 = vmatpush.msrb.mxu2 %v1268_v44  ;;  %v1125_v52 = vmul.f32 %v1115_v40, %v831_v47  ;;  %1650 = vmatpush.msrb.mxu3 %v1348_v12  ;;  %v1332_v33 = vld [vmem:[#allocation10 + $0x528] sm:$0xff]  ;;  %v1451_v47 = vld [vmem:[#allocation10 + $0x8e0] sm:$0xff] }
 0x168   :  { %1609 = vmatpush.msrb.mxu1 %v1200_v50  ;;  %1582 = vmatpush.msrb.mxu0 %v1471_v13  ;;  %v1480_v36 = vld [vmem:[#allocation10 + $0x9c8] sm:$0xff]  ;;  %v1139_v50 = vperm.slane %v2333_v48, 2 }
 0x169   :  { %1632 = vmatpush.msrb.mxu2 %v1264_v51  ;;  %v1148_v56 = vadd.f32 %v1138_v49, %v1125_v52  ;;  %1651 = vmatpush.msrb.mxu3 %v1344_v39  ;;  %v1328_v44 = vld [vmem:[#allocation10 + $0x508] sm:$0xff]  ;;  %v1447_v52 = vld [vmem:[#allocation10 + $0x8c0] sm:$0xff] }
 0x16a   :  { %1610 = vmatpush.msrb.mxu1 %v1196_v53  ;;  %1583 = vmatpush.msrb.mxu0 %v1467_v18  ;;  %v853_v25 = vpop.f32.mrf.mxu0  ;;  %v876_v26 = vpop.f32.mrf.mxu1  ;;  %v1476_v46 = vld [vmem:[#allocation10 + $0x9a8] sm:$0xff] }
 0x16b   :  { %1633 = vmatpush.msrb.mxu2 %v1260_v54  ;;  %v2349_v2 = vmax.f32 %v1148_v56, 0.0  ;;  %1652 = vmatpush.msrb.mxu3 %v1340_v20  ;;  %v877_v32 = vadd.f32 %v876_v26, %v853_v25  ;;  %v1324_v51 = vld [vmem:[#allocation10 + $0x4e8] sm:$0xff]  ;;  %v1209_v26 = vld [vmem:[#allocation10 + $0x150] sm:$0xff] }
 0x16c   :  { %v810_v6 = vpop.f32.mrf.mxu2  ;;  %1611 = vmatpush.msrb.mxu1 %v1192_v57  ;;  %v833_v10 = vpop.f32.mrf.mxu3  ;;  %1584 = vmatpush.msrb.mxu0 %v1463_v21  ;;  %v1472_v54 = vld [vmem:[#allocation10 + $0x988] sm:$0xff] }
 0x16d   :  { %1634 = vmatpush.msrb.mxu2 %v1256_v58  ;;  %v811_v9 = vadd.f32 %v810_v6, %v788_v1  ;;  %1526 = vmatmul.f32.vlgmr.msra.gmra.mxu1 %v2349_v2  ;;  %v1320_v55 = vld [vmem:[#allocation10 + $0x4c8] sm:$0xff]  ;;  %v1443_v58 = vld [vmem:[#allocation10 + $0x8a0] sm:$0xff] }
 0x16e   :  { %1612 = vmatpush.msrb.mxu1 %v1188_v3  ;;  %1653 = vmatpush.msrb.mxu3 %v1336_v62  ;;  %v1468_v60 = vld [vmem:[#allocation10 + $0x968] sm:$0xff] }
 0x16f   :  { %1635 = vmatpush.msrb.mxu2 %v1252_v4  ;;  %v834_v14 = vadd.f32 %v833_v10, %v811_v9  ;;  %1585 = vmatpush.msrb.mxu0 %v1459_v31  ;;  %v1316_v61 = vld [vmem:[#allocation10 + $0x4a8] sm:$0xff]  ;;  %v1229_v4 = vld [vmem:[#allocation10 + $0x1f0] sm:$0xff] }
 0x170   :  { %1613 = vmatpush.msrb.mxu1 %v1184_v16  ;;  %1654 = vmatpush.msrb.mxu3 %v1332_v33  ;;  %v1464_v5 = vld [vmem:[#allocation10 + $0x948] sm:$0xff]  ;;  %v1225_v16 = vld [vmem:[#allocation10 + $0x1d0] sm:$0xff] }
 0x171   :  { %1636 = vmatpush.msrb.mxu2 %v1248_v17  ;;  %v1130_v42 = vmul.f32 %v1115_v40, %v834_v14  ;;  %1586 = vmatpush.msrb.mxu0 %v1455_v37  ;;  %v1312_v7 = vld [vmem:[#allocation10 + $0x488] sm:$0xff]  ;;  %v1221_v14 = vld [vmem:[#allocation10 + $0x1b0] sm:$0xff] }
 0x172   :  { %1614 = vmatpush.msrb.mxu1 %v1180_v15  ;;  %1655 = vmatpush.msrb.mxu3 %v1328_v44  ;;  %v1460_v17 = vld [vmem:[#allocation10 + $0x928] sm:$0xff]  ;;  %v1201_v33 = vld [vmem:[#allocation10 + $0x110] sm:$0xff] }
 0x173   :  { %1637 = vmatpush.msrb.mxu2 %v1244_v38  ;;  %v1153_v22 = vadd.f32 %v1138_v49, %v1130_v42  ;;  %1587 = vmatpush.msrb.mxu0 %v1451_v47  ;;  %v1308_v12 = vld [vmem:[#allocation10 + $0x468] sm:$0xff]  ;;  %v1431_v38 = vld [vmem:[#allocation10 + $0x840] sm:$0xff]  ;;  %v1217_v42 = vld [vmem:[#allocation10 + $0x190] sm:$0xff] }
 0x174   :  { %1615 = vmatpush.msrb.mxu1 %v1176_v43  ;;  %1656 = vmatpush.msrb.mxu3 %v1324_v51  ;;  %v1456_v15 = vld [vmem:[#allocation10 + $0x908] sm:$0xff]  ;;  %v1197_v37 = vld [vmem:[#allocation10 + $0xf0] sm:$0xff] }
 0x175   :  { %1638 = vmatpush.msrb.mxu2 %v1240_v19  ;;  %v2356_v63 = vmax.f32 %v1153_v22, 0.0  ;;  %v856_v56 = vpop.f32.mrf.mxu0  ;;  %v879_v57 = vpop.f32.mrf.mxu1  ;;  %1588 = vmatpush.msrb.mxu0 %v1447_v52  ;;  %v1304_v39 = vld [vmem:[#allocation10 + $0x448] sm:$0xff]  ;;  %v1427_v19 = vld [vmem:[#allocation10 + $0x820] sm:$0xff]  ;;  %v1213_v22 = vld [vmem:[#allocation10 + $0x170] sm:$0xff] }
 0x176   :  { %1616 = vmatpush.msrb.mxu1 %v1172_v23  ;;  %1657 = vmatpush.msrb.mxu3 %v1320_v55  ;;  %v880_v1 = vadd.f32 %v879_v57, %v856_v56  ;;  %v1452_v43 = vld [vmem:[#allocation10 + $0x8e8] sm:$0xff]  ;;  %v1193_v44 = vld [vmem:[#allocation10 + $0xd0] sm:$0xff] }
 0x177   :  { %1639 = vmatpush.msrb.mxu2 %v1236_v24  ;;  %1529 = vmatmul.f32.gmra.mxu1 %v2356_v63  ;;  %v1300_v20 = vld [vmem:[#allocation10 + $0x428] sm:$0xff]  ;;  %v1423_v24 = vld [vmem:[#allocation10 + $0x800] sm:$0xff]  ;;  %v1189_v47 = vld [vmem:[#allocation10 + $0xb0] sm:$0xff] }
 0x178   :  { %v899_v34 = vpop.f32.mrf.mxu2  ;;  %1617 = vmatpush.msrb.mxu1 %v1168_v27  ;;  %v922_v45 = vpop.f32.mrf.mxu3  ;;  %1589 = vmatpush.msrb.mxu0 %v1443_v58  ;;  %v1448_v23 = vld [vmem:[#allocation10 + $0x8c8] sm:$0xff]  ;;  %v1421_v52 = vld [vmem:[#allocation10 + $0x7f0] sm:$0xff] }
 0x179   :  { %1640 = vmatpush.msrb.mxu2 %v1232_v28  ;;  %v900_v40 = vadd.f32 %v899_v34, %v877_v32  ;;  %1658 = vmatpush.msrb.mxu3 %v1316_v61  ;;  %v1444_v62 = vld [vmem:[#allocation10 + $0x8a8] sm:$0xff]  ;;  %v1417_v55 = vld [vmem:[#allocation10 + $0x7d0] sm:$0xff] }
 0x17a   :  { %1694 = vmatpush.msra.mxu1 %v1484_v29  ;;  %1590 = vmatpush.msrb.mxu0 %v1439_v0  ;;  %v1296_v27 = vld [vmem:[#allocation10 + $0x408] sm:$0xff]  ;;  %v1205_v29 = vld [vmem:[#allocation10 + $0x130] sm:$0xff]  ;;  %v1117_v0 = vperm.slane %v2331_v35, 3 }
 0x17b   :  { %v923_v49 = vadd.f32 %v922_v45, %v900_v40  ;;  %1659 = vmatpush.msrb.mxu3 %v1312_v7  ;;  %v1420_v28 = vld [vmem:[#allocation10 + $0x7e8] sm:$0xff]  ;;  %v1181_v58 = vld [vmem:[#allocation10 + $0x70] sm:$0xff] }
 0x17c   :  { %1695 = vmatpush.msra.mxu1 %v1480_v36  ;;  %1591 = vmatpush.msrb.mxu0 %v1435_v8  ;;  %v1440_v31 = vld [vmem:[#allocation10 + $0x888] sm:$0xff]  ;;  %v1140_v8 = vperm.slane %v2333_v48, 3 }
 0x17d   :  { %v1126_v53 = vmul.f32 %v1116_v41, %v923_v49  ;;  %1660 = vmatpush.msrb.mxu3 %v1308_v12  ;;  %v1416_v32 = vld [vmem:[#allocation10 + $0x7c8] sm:$0xff]  ;;  %v1169_v12 = vld [vmem:[#allocation10 + $0x10] sm:$0xff] }
 0x17e   :  { %1696 = vmatpush.msra.mxu1 %v1476_v46  ;;  %1592 = vmatpush.msrb.mxu0 %v1431_v38  ;;  %v1436_v34 = vld [vmem:[#allocation10 + $0x868] sm:$0xff]  ;;  %v1485_v38 = vld [vmem:[#allocation10 + $0x9f0] sm:$0xff] }
 0x17f   :  { %v1149_v59 = vadd.f32 %v1139_v50, %v1126_v53  ;;  %1618 = vmatmul.f32.vlgmr.msrb.gmra.mxu1 %v2337_v11  ;;  %1661 = vmatpush.msrb.mxu3 %v1304_v39  ;;  %v1412_v36 = vld [vmem:[#allocation10 + $0x7a8] sm:$0xff]  ;;  %v1401_v39 = vld [vmem:[#allocation10 + $0x750] sm:$0xff] }
 0x180   :  { %1697 = vmatpush.msra.mxu1 %v1472_v54  ;;  %1593 = vmatpush.msrb.mxu0 %v1427_v19  ;;  %v1432_v40 = vld [vmem:[#allocation10 + $0x848] sm:$0xff]  ;;  %v1185_v54 = vld [vmem:[#allocation10 + $0x90] sm:$0xff] }
 0x181   :  { %v2362_v3 = vmax.f32 %v1149_v59, 0.0  ;;  %1662 = vmatpush.msrb.mxu3 %v1300_v20  ;;  %v1428_v45 = vld [vmem:[#allocation10 + $0x828] sm:$0xff]  ;;  %v1293_v20 = vld [vmem:[#allocation10 + $0x3f0] sm:$0xff] }
 0x182   :  { %v902_v6 = vpop.f32.mrf.mxu2  ;;  %1698 = vmatpush.msra.mxu1 %v1468_v60  ;;  %v925_v10 = vpop.f32.mrf.mxu3  ;;  %1594 = vmatpush.msrb.mxu0 %v1423_v24  ;;  %v1404_v46 = vld [vmem:[#allocation10 + $0x768] sm:$0xff]  ;;  %v1413_v60 = vld [vmem:[#allocation10 + $0x7b0] sm:$0xff] }
 0x183   :  { %v903_v9 = vadd.f32 %v902_v6, %v880_v1  ;;  %1549 = vmatmul.f32.vlgmr.msra.gmra.mxu2 %v2362_v3  ;;  %1663 = vmatpush.msrb.mxu3 %v1296_v27  ;;  %v1424_v49 = vld [vmem:[#allocation10 + $0x808] sm:$0xff]  ;;  %v1177_v1 = vld [vmem:[#allocation10 + $0x50] sm:$0xff] }
 0x184   :  { %1717 = vmatpush.msra.mxu2 %v1229_v4  ;;  %1699 = vmatpush.msra.mxu1 %v1464_v5  ;;  %v1400_v53 = vld [vmem:[#allocation10 + $0x748] sm:$0xff]  ;;  %v1409_v6 = vld [vmem:[#allocation10 + $0x790] sm:$0xff] }
 0x185   :  { %v926_v13 = vadd.f32 %v925_v10, %v903_v9  ;;  %1671 = vmatpush.msra.mxu0 %v1420_v28  ;;  %v1396_v56 = vld [vmem:[#allocation10 + $0x728] sm:$0xff]  ;;  %v1173_v9 = vld [vmem:[#allocation10 + $0x30] sm:$0xff] }
 0x186   :  { %1718 = vmatpush.msra.mxu2 %v1225_v16  ;;  %1700 = vmatpush.msra.mxu1 %v1460_v17  ;;  %v1392_v4 = vld [vmem:[#allocation10 + $0x708] sm:$0xff]  ;;  %v1405_v17 = vld [vmem:[#allocation10 + $0x770] sm:$0xff] }
 0x187   :  { %v1131_v18 = vmul.f32 %v1116_v41, %v926_v13  ;;  %1621 = vmatmul.f32.gmra.mxu1 %v2340_v30  ;;  %1672 = vmatpush.msra.mxu0 %v1416_v32  ;;  %v1408_v41 = vld [vmem:[#allocation10 + $0x788] sm:$0xff]  ;;  %v1477_v27 = vld [vmem:[#allocation10 + $0x9b0] sm:$0xff] }
 0x188   :  { %1719 = vmatpush.msra.mxu2 %v1221_v14  ;;  %1701 = vmatpush.msra.mxu1 %v1456_v15  ;;  %v1388_v16 = vld [vmem:[#allocation10 + $0x6e8] sm:$0xff] }
 0x189   :  { %v1154_v21 = vadd.f32 %v1139_v50, %v1131_v18  ;;  %1673 = vmatpush.msra.mxu0 %v1412_v36  ;;  %v1384_v13 = vld [vmem:[#allocation10 + $0x6c8] sm:$0xff]  ;;  %v1389_v36 = vld [vmem:[#allocation10 + $0x6f0] sm:$0xff] }
 0x18a   :  { %1720 = vmatpush.msra.mxu2 %v1217_v42  ;;  %1702 = vmatpush.msra.mxu1 %v1452_v43  ;;  %v1380_v42 = vld [vmem:[#allocation10 + $0x6a8] sm:$0xff] }
 0x18b   :  { %v2366_v25 = vmax.f32 %v1154_v21, 0.0  ;;  %1674 = vmatpush.msra.mxu0 %v1408_v41  ;;  %v1481_v21 = vld [vmem:[#allocation10 + $0x9d0] sm:$0xff]  ;;  %v1376_v24 = vld [vmem:[#allocation10 + $0x688] sm:$0xff] }
 0x18c   :  { %1721 = vmatpush.msra.mxu2 %v1213_v22  ;;  %1703 = vmatpush.msra.mxu1 %v1448_v23  ;;  %v1397_v23 = vld [vmem:[#allocation10 + $0x730] sm:$0xff] }
 0x18d   :  { %1552 = vmatmul.f32.gmra.mxu2 %v2366_v25  ;;  %v945_v50 = vpop.f32.mrf.mxu0  ;;  %v968_v51 = vpop.f32.mrf.mxu1  ;;  %1675 = vmatpush.msra.mxu0 %v1404_v46  ;;  %v1281_v41 = vld [vmem:[#allocation10 + $0x390] sm:$0xff] }
 0x18e   :  { %1722 = vmatpush.msra.mxu2 %v1209_v26  ;;  %1704 = vmatpush.msra.mxu1 %v1444_v62  ;;  %v969_v57 = vadd.f32 %v968_v51, %v945_v50  ;;  %v1289_v62 = vld [vmem:[#allocation10 + $0x3d0] sm:$0xff] }
 0x18f   :  { %1676 = vmatpush.msra.mxu0 %v1400_v53  ;;  %v1381_v50 = vld [vmem:[#allocation10 + $0x6b0] sm:$0xff] }
 0x190   :  { %1723 = vmatpush.msra.mxu2 %v1205_v29  ;;  %1705 = vmatpush.msra.mxu1 %v1440_v31  ;;  %v1393_v29 = vld [vmem:[#allocation10 + $0x710] sm:$0xff]  ;;  %v1372_v31 = vld [vmem:[#allocation10 + $0x668] sm:$0xff] }
 0x191   :  { %1677 = vmatpush.msra.mxu0 %v1396_v56  ;;  %v1461_v53 = vld [vmem:[#allocation10 + $0x930] sm:$0xff] }
 0x192   :  { %1724 = vmatpush.msra.mxu2 %v1201_v33  ;;  %1706 = vmatpush.msra.mxu1 %v1436_v34  ;;  %v1285_v33 = vld [vmem:[#allocation10 + $0x3b0] sm:$0xff] }
 0x193   :  { %1678 = vmatpush.msra.mxu0 %v1392_v4  ;;  %v1473_v34 = vld [vmem:[#allocation10 + $0x990] sm:$0xff] }
 0x194   :  { %1725 = vmatpush.msra.mxu2 %v1197_v37  ;;  %1707 = vmatpush.msra.mxu1 %v1432_v40  ;;  %v1368_v37 = vld [vmem:[#allocation10 + $0x648] sm:$0xff]  ;;  %v1269_v56 = vld [vmem:[#allocation10 + $0x330] sm:$0xff] }
 0x195   :  { %1641 = vmatmul.f32.vlgmr.msrb.gmra.mxu2 %v2349_v2  ;;  %1679 = vmatpush.msra.mxu0 %v1388_v16  ;;  %v1449_v4 = vld [vmem:[#allocation10 + $0x8d0] sm:$0xff] }
 0x196   :  { %1726 = vmatpush.msra.mxu2 %v1193_v44  ;;  %1708 = vmatpush.msra.mxu1 %v1428_v45  ;;  %v1469_v44 = vld [vmem:[#allocation10 + $0x970] sm:$0xff] }
 0x197   :  { %v948_v14 = vpop.f32.mrf.mxu0  ;;  %v971_v15 = vpop.f32.mrf.mxu1  ;;  %1680 = vmatpush.msra.mxu0 %v1384_v13  ;;  %v1385_v45 = vld [vmem:[#allocation10 + $0x6d0] sm:$0xff] }
 0x198   :  { %1727 = vmatpush.msra.mxu2 %v1189_v47  ;;  %1709 = vmatpush.msra.mxu1 %v1424_v49  ;;  %v972_v43 = vadd.f32 %v971_v15, %v948_v14  ;;  %v1277_v47 = vld [vmem:[#allocation10 + $0x370] sm:$0xff] }
 0x199   :  { %1681 = vmatpush.msra.mxu0 %v1380_v42  ;;  %v1465_v49 = vld [vmem:[#allocation10 + $0x950] sm:$0xff] }
 0x19a   :  { %1786 = vmatpush.msrb.mxu1 %v1421_v52  ;;  %v991_v59 = vpop.f32.mrf.mxu2  ;;  %1728 = vmatpush.msra.mxu2 %v1185_v54  ;;  %v1014_v5 = vpop.f32.mrf.mxu3  ;;  %v1273_v52 = vld [vmem:[#allocation10 + $0x350] sm:$0xff] }
 0x19b   :  { %v992_v61 = vadd.f32 %v991_v59, %v969_v57  ;;  %1682 = vmatpush.msra.mxu0 %v1376_v24  ;;  %v1377_v54 = vld [vmem:[#allocation10 + $0x690] sm:$0xff]  ;;  %v1360_v59 = vld [vmem:[#allocation10 + $0x608] sm:$0xff] }
 0x19c   :  { %1787 = vmatpush.msrb.mxu1 %v1417_v55  ;;  %1729 = vmatpush.msra.mxu2 %v1181_v58  ;;  %v1364_v55 = vld [vmem:[#allocation10 + $0x628] sm:$0xff]  ;;  %v1457_v57 = vld [vmem:[#allocation10 + $0x910] sm:$0xff] }
 0x19d   :  { %v1015_v7 = vadd.f32 %v1014_v5, %v992_v61  ;;  %1644 = vmatmul.f32.gmra.mxu2 %v2356_v63  ;;  %1683 = vmatpush.msra.mxu0 %v1372_v31  ;;  %v1373_v58 = vld [vmem:[#allocation10 + $0x670] sm:$0xff] }
 0x19e   :  { %1788 = vmatpush.msrb.mxu1 %v1413_v60  ;;  %1730 = vmatpush.msra.mxu2 %v1177_v1  ;;  %v1265_v60 = vld [vmem:[#allocation10 + $0x310] sm:$0xff] }
 0x19f   :  { %v1127_v10 = vmul.f32 %v1117_v0, %v1015_v7  ;;  %1684 = vmatpush.msra.mxu0 %v1368_v37  ;;  %v1453_v61 = vld [vmem:[#allocation10 + $0x8f0] sm:$0xff] }
 0x1a0   :  { %1789 = vmatpush.msrb.mxu1 %v1409_v6  ;;  %1731 = vmatpush.msra.mxu2 %v1173_v9  ;;  %v1261_v1 = vld [vmem:[#allocation10 + $0x2f0] sm:$0xff] }
 0x1a1   :  { %v1150_v18 = vadd.f32 %v1140_v8, %v1127_v10  ;;  %1685 = vmatpush.msra.mxu0 %v1364_v55  ;;  %v1365_v5 = vld [vmem:[#allocation10 + $0x630] sm:$0xff] }
 0x1a2   :  { %1790 = vmatpush.msrb.mxu1 %v1405_v17  ;;  %1732 = vmatpush.msra.mxu2 %v1169_v12  ;;  %v1257_v6 = vld [vmem:[#allocation10 + $0x2d0] sm:$0xff] }
 0x1a3   :  { %v2373_v19 = vmax.f32 %v1150_v18, 0.0  ;;  %1686 = vmatpush.msra.mxu0 %v1360_v59  ;;  %v1445_v7 = vld [vmem:[#allocation10 + $0x8b0] sm:$0xff] }
 0x1a4   :  { %1809 = vmatpush.msrb.mxu2 %v1485_v38  ;;  %1791 = vmatpush.msrb.mxu1 %v1401_v39  ;;  %v994_v22 = vpop.f32.mrf.mxu2  ;;  %v1017_v28 = vpop.f32.mrf.mxu3  ;;  %v1253_v17 = vld [vmem:[#allocation10 + $0x2b0] sm:$0xff] }
 0x1a5   :  { %v995_v26 = vadd.f32 %v994_v22, %v972_v43  ;;  %1572 = vmatmul.f32.vlgmr.msra.gmra.mxu3 %v2373_v19  ;;  %1733 = vmatmul.f32.vlgmr.msra.gmra.mxu2 %v2337_v11  ;;  %v1441_v10 = vld [vmem:[#allocation10 + $0x890] sm:$0xff] }
 0x1a6   :  { %1740 = vmatpush.msra.mxu3 %v1293_v20  ;;  %1810 = vmatpush.msrb.mxu2 %v1481_v21  ;;  %v1249_v12 = vld [vmem:[#allocation10 + $0x290] sm:$0xff]  ;;  %v1118_v21 = vperm.slane %v2331_v35, 4  ;;  %v1418_v35 = vld [vmem:[#allocation10 + $0x7d8] sm:$0xff] }
 0x1a7   :  { %v1018_v32 = vadd.f32 %v1017_v28, %v995_v26  ;;  %1792 = vmatpush.msrb.mxu1 %v1397_v23  ;;  %v1437_v13 = vld [vmem:[#allocation10 + $0x870] sm:$0xff]  ;;  %v1141_v26 = vperm.slane %v2333_v48, 4 }
 0x1a8   :  { %1741 = vmatpush.msra.mxu3 %v1289_v62  ;;  %1811 = vmatpush.msrb.mxu2 %v1477_v27  ;;  %v1245_v14 = vld [vmem:[#allocation10 + $0x270] sm:$0xff]  ;;  %v1422_v62 = vld [vmem:[#allocation10 + $0x7f8] sm:$0xff] }
 0x1a9   :  { %v1132_v40 = vmul.f32 %v1117_v0, %v1018_v32  ;;  %1793 = vmatpush.msrb.mxu1 %v1393_v29  ;;  %v1369_v0 = vld [vmem:[#allocation10 + $0x650] sm:$0xff]  ;;  %v1230_v32 = vld [vmem:[#allocation10 + $0x1f8] sm:$0xff] }
 0x1aa   :  { %1742 = vmatpush.msra.mxu3 %v1285_v33  ;;  %1812 = vmatpush.msrb.mxu2 %v1473_v34  ;;  %v1433_v15 = vld [vmem:[#allocation10 + $0x850] sm:$0xff] }
 0x1ab   :  { %v1155_v46 = vadd.f32 %v1140_v8, %v1132_v40  ;;  %1794 = vmatpush.msrb.mxu1 %v1389_v36  ;;  %v1361_v8 = vld [vmem:[#allocation10 + $0x610] sm:$0xff]  ;;  %v1414_v36 = vld [vmem:[#allocation10 + $0x7b8] sm:$0xff] }
 0x1ac   :  { %1743 = vmatpush.msra.mxu3 %v1281_v41  ;;  %1813 = vmatpush.msrb.mxu2 %v1469_v44  ;;  %v1241_v42 = vld [vmem:[#allocation10 + $0x250] sm:$0xff] }
 0x1ad   :  { %v2377_v51 = vmax.f32 %v1155_v46, 0.0  ;;  %1736 = vmatmul.f32.gmra.mxu2 %v2340_v30  ;;  %1795 = vmatpush.msrb.mxu1 %v1385_v45  ;;  %v1429_v43 = vld [vmem:[#allocation10 + $0x830] sm:$0xff]  ;;  %v1358_v45 = vld [vmem:[#allocation10 + $0x5f8] sm:$0xff] }
 0x1ae   :  { %1744 = vmatpush.msra.mxu3 %v1277_v47  ;;  %1814 = vmatpush.msrb.mxu2 %v1465_v49  ;;  %v1237_v22 = vld [vmem:[#allocation10 + $0x230] sm:$0xff]  ;;  %v1226_v46 = vld [vmem:[#allocation10 + $0x1d8] sm:$0xff] }
 0x1af   :  { %1575 = vmatmul.f32.gmra.mxu3 %v2377_v51  ;;  %1796 = vmatpush.msrb.mxu1 %v1381_v50  ;;  %v1425_v23 = vld [vmem:[#allocation10 + $0x810] sm:$0xff]  ;;  %v1410_v50 = vld [vmem:[#allocation10 + $0x798] sm:$0xff] }
 0x1b0   :  { %1745 = vmatpush.msra.mxu3 %v1273_v52  ;;  %1815 = vmatpush.msrb.mxu2 %v1461_v53  ;;  %v1233_v29 = vld [vmem:[#allocation10 + $0x210] sm:$0xff]  ;;  %v1354_v52 = vld [vmem:[#allocation10 + $0x5d8] sm:$0xff] }
 0x1b1   :  { %1797 = vmatpush.msrb.mxu1 %v1377_v54  ;;  %v1037_v9 = vpop.f32.mrf.mxu0  ;;  %v1060_v16 = vpop.f32.mrf.mxu1  ;;  %v1357_v41 = vld [vmem:[#allocation10 + $0x5f0] sm:$0xff]  ;;  %v1222_v53 = vld [vmem:[#allocation10 + $0x1b8] sm:$0xff] }
 0x1b2   :  { %1746 = vmatpush.msra.mxu3 %v1269_v56  ;;  %1816 = vmatpush.msrb.mxu2 %v1457_v57  ;;  %v1061_v38 = vadd.f32 %v1060_v16, %v1037_v9  ;;  %v1353_v49 = vld [vmem:[#allocation10 + $0x5d0] sm:$0xff]  ;;  %v1406_v56 = vld [vmem:[#allocation10 + $0x778] sm:$0xff] }
 0x1b3   :  { %1798 = vmatpush.msrb.mxu1 %v1373_v58  ;;  %v1349_v55 = vld [vmem:[#allocation10 + $0x5b0] sm:$0xff]  ;;  %v1350_v57 = vld [vmem:[#allocation10 + $0x5b8] sm:$0xff] }
 0x1b4   :  { %1747 = vmatpush.msra.mxu3 %v1265_v60  ;;  %1817 = vmatpush.msrb.mxu2 %v1453_v61  ;;  %v1218_v58 = vld [vmem:[#allocation10 + $0x198] sm:$0xff]  ;;  %v1345_v60 = vld [vmem:[#allocation10 + $0x590] sm:$0xff] }
 0x1b5   :  { %1799 = vmatpush.msrb.mxu1 %v1369_v0  ;;  %v1346_v61 = vld [vmem:[#allocation10 + $0x598] sm:$0xff]  ;;  %v1333_v16 = vld [vmem:[#allocation10 + $0x530] sm:$0xff] }
 0x1b6   :  { %1748 = vmatpush.msra.mxu3 %v1261_v1  ;;  %1818 = vmatpush.msrb.mxu2 %v1449_v4  ;;  %v1341_v1 = vld [vmem:[#allocation10 + $0x570] sm:$0xff]  ;;  %v1214_v4 = vld [vmem:[#allocation10 + $0x178] sm:$0xff] }
 0x1b7   :  { %1664 = vmatmul.f32.vlgmr.msrb.gmra.mxu3 %v2362_v3  ;;  %1800 = vmatpush.msrb.mxu1 %v1365_v5  ;;  %v1342_v5 = vld [vmem:[#allocation10 + $0x578] sm:$0xff] }
 0x1b8   :  { %1749 = vmatpush.msra.mxu3 %v1257_v6  ;;  %1819 = vmatpush.msrb.mxu2 %v1445_v7  ;;  %v1337_v6 = vld [vmem:[#allocation10 + $0x550] sm:$0xff]  ;;  %v1210_v7 = vld [vmem:[#allocation10 + $0x158] sm:$0xff] }
 0x1b9   :  { %1801 = vmatpush.msrb.mxu1 %v1361_v8  ;;  %v1040_v27 = vpop.f32.mrf.mxu0  ;;  %v1063_v28 = vpop.f32.mrf.mxu1  ;;  %v1402_v8 = vld [vmem:[#allocation10 + $0x758] sm:$0xff] }
 0x1ba   :  { %1750 = vmatpush.msra.mxu3 %v1253_v17  ;;  %1820 = vmatpush.msrb.mxu2 %v1441_v10  ;;  %v1064_v33 = vadd.f32 %v1063_v28, %v1040_v27  ;;  %v1338_v9 = vld [vmem:[#allocation10 + $0x558] sm:$0xff]  ;;  %v1313_v28 = vld [vmem:[#allocation10 + $0x490] sm:$0xff] }
 0x1bb   :  { %v1206_v17 = vld [vmem:[#allocation10 + $0x138] sm:$0xff] }
 0x1bc   :  { %1751 = vmatpush.msra.mxu3 %v1249_v12  ;;  %1821 = vmatpush.msrb.mxu2 %v1437_v13  ;;  %v1398_v10 = vld [vmem:[#allocation10 + $0x738] sm:$0xff]  ;;  %v1329_v13 = vld [vmem:[#allocation10 + $0x510] sm:$0xff] }
 0x1bd   :  { %v1083_v39 = vpop.f32.mrf.mxu2  ;;  %v1106_v18 = vpop.f32.mrf.mxu3  ;;  %v1334_v12 = vld [vmem:[#allocation10 + $0x538] sm:$0xff] }
 0x1be   :  { %v1084_v20 = vadd.f32 %v1083_v39, %v1061_v38  ;;  %1752 = vmatpush.msra.mxu3 %v1245_v14  ;;  %1822 = vmatpush.msrb.mxu2 %v1433_v15  ;;  %v1202_v14 = vld [vmem:[#allocation10 + $0x118] sm:$0xff]  ;;  %v1325_v39 = vld [vmem:[#allocation10 + $0x4f0] sm:$0xff] }
 0x1bf   :  { %1667 = vmatmul.f32.gmra.mxu3 %v2366_v25  ;;  %v1394_v15 = vld [vmem:[#allocation10 + $0x718] sm:$0xff] }
 0x1c0   :  { %v1107_v24 = vadd.f32 %v1106_v18, %v1084_v20  ;;  %1753 = vmatpush.msra.mxu3 %v1241_v42  ;;  %1823 = vmatpush.msrb.mxu2 %v1429_v43  ;;  %v1330_v38 = vld [vmem:[#allocation10 + $0x518] sm:$0xff]  ;;  %v1321_v20 = vld [vmem:[#allocation10 + $0x4d0] sm:$0xff] }
 0x1c1   :  { %v1198_v18 = vld [vmem:[#allocation10 + $0xf8] sm:$0xff] }
 0x1c2   :  { %v1128_v31 = vmul.f32 %v1118_v21, %v1107_v24  ;;  %1754 = vmatpush.msra.mxu3 %v1237_v22  ;;  %1824 = vmatpush.msrb.mxu2 %v1425_v23  ;;  %v1326_v42 = vld [vmem:[#allocation10 + $0x4f8] sm:$0xff]  ;;  %v1317_v24 = vld [vmem:[#allocation10 + $0x4b0] sm:$0xff] }
 0x1c3   :  { %v1390_v43 = vld [vmem:[#allocation10 + $0x6f8] sm:$0xff] }
 0x1c4   :  { %1901 = vmatpush.msra.mxu2 %v1422_v62  ;;  %v1151_v34 = vadd.f32 %v1141_v26, %v1128_v31  ;;  %1755 = vmatpush.msra.mxu3 %v1233_v29  ;;  %v1322_v22 = vld [vmem:[#allocation10 + $0x4d8] sm:$0xff] }
 0x1c5   :  { %v1086_v37 = vpop.f32.mrf.mxu2  ;;  %v1109_v44 = vpop.f32.mrf.mxu3  ;;  %v1386_v23 = vld [vmem:[#allocation10 + $0x6d8] sm:$0xff] }
 0x1c6   :  { %1832 = vmatpush.msrb.mxu3 %v1230_v32  ;;  %1902 = vmatpush.msra.mxu2 %v1418_v35  ;;  %v2385_v48 = vmax.f32 %v1151_v34, 0.0  ;;  %v1087_v40 = vadd.f32 %v1086_v37, %v1064_v33  ;;  %v1318_v62 = vld [vmem:[#allocation10 + $0x4b8] sm:$0xff]  ;;  %v1309_v35 = vld [vmem:[#allocation10 + $0x470] sm:$0xff] }
 0x1c7   :  { %1756 = vmatmul.f32.vlgmr.msra.gmra.mxu3 %v2349_v2  ;;  %v1382_v27 = vld [vmem:[#allocation10 + $0x6b8] sm:$0xff]  ;;  %v1305_v37 = vld [vmem:[#allocation10 + $0x450] sm:$0xff] }
 0x1c8   :  { %1903 = vmatpush.msra.mxu2 %v1414_v36  ;;  %v1110_v47 = vadd.f32 %v1109_v44, %v1087_v40  ;;  %1595 = vmatmul.f32.vlgmr.msrb.gmra.mxu0 %v2385_v48  ;;  %v1186_v29 = vld [vmem:[#allocation10 + $0x98] sm:$0xff] }
 0x1c9   :  { %1710 = vmatmul.f32.vlgmr.msra.gmra.mxu1 %v2385_v48  ;;  %1763 = vmatpush.msrb.mxu0 %v1357_v41  ;;  %v1314_v31 = vld [vmem:[#allocation10 + $0x498] sm:$0xff] }
 0x1ca   :  { %1825 = vmatmul.f32.vlgmr.msrb.gmra.mxu2 %v2385_v48  ;;  %v1133_v54 = vmul.f32 %v1118_v21, %v1110_v47  ;;  %1878 = vmatpush.msra.mxu1 %v1358_v45  ;;  %v1194_v21 = vld [vmem:[#allocation10 + $0xd8] sm:$0xff]  ;;  %v1301_v45 = vld [vmem:[#allocation10 + $0x430] sm:$0xff] }
 0x1cb   :  { %1833 = vmatpush.msrb.mxu3 %v1226_v46  ;;  %1764 = vmatpush.msrb.mxu0 %v1353_v49  ;;  %v1378_v32 = vld [vmem:[#allocation10 + $0x698] sm:$0xff] }
 0x1cc   :  { %1904 = vmatpush.msra.mxu2 %v1410_v50  ;;  %v1156_v59 = vadd.f32 %v1141_v26, %v1133_v54  ;;  %1879 = vmatpush.msra.mxu1 %v1354_v52  ;;  %v1190_v26 = vld [vmem:[#allocation10 + $0xb8] sm:$0xff]  ;;  %v1297_v50 = vld [vmem:[#allocation10 + $0x410] sm:$0xff] }
 0x1cd   :  { %1834 = vmatpush.msrb.mxu3 %v1222_v53  ;;  %1765 = vmatpush.msrb.mxu0 %v1349_v55  ;;  %v1182_v33 = vld [vmem:[#allocation10 + $0x78] sm:$0xff] }
 0x1ce   :  { %1905 = vmatpush.msra.mxu2 %v1406_v56  ;;  %v2391_v0 = vmax.f32 %v1156_v59, 0.0  ;;  %1880 = vmatpush.msra.mxu1 %v1350_v57  ;;  %v1310_v34 = vld [vmem:[#allocation10 + $0x478] sm:$0xff] }
 0x1cf   :  { %1835 = vmatpush.msrb.mxu3 %v1218_v58  ;;  %1766 = vmatpush.msrb.mxu0 %v1345_v60  ;;  %v1374_v36 = vld [vmem:[#allocation10 + $0x678] sm:$0xff] }
 0x1d0   :  { %1759 = vmatmul.f32.gmra.mxu3 %v2356_v63  ;;  %1881 = vmatpush.msra.mxu1 %v1346_v61  ;;  %v1178_v40 = vld [vmem:[#allocation10 + $0x58] sm:$0xff] }
 0x1d1   :  { %1598 = vmatmul.f32.gmra.mxu0 %v2391_v0  ;;  %1713 = vmatmul.f32.gmra.mxu1 %v2391_v0  ;;  %v1306_v41 = vld [vmem:[#allocation10 + $0x458] sm:$0xff] }
 0x1d2   :  { %1767 = vmatpush.msrb.mxu0 %v1341_v1  ;;  %1836 = vmatpush.msrb.mxu3 %v1214_v4  ;;  %v1370_v44 = vld [vmem:[#allocation10 + $0x658] sm:$0xff] }
 0x1d3   :  { %1828 = vmatmul.f32.gmra.mxu2 %v2391_v0  ;;  %1882 = vmatpush.msra.mxu1 %v1342_v5  ;;  %v1174_v46 = vld [vmem:[#allocation10 + $0x38] sm:$0xff] }
 0x1d4   :  { %1768 = vmatpush.msrb.mxu0 %v1337_v6  ;;  %1837 = vmatpush.msrb.mxu3 %v1210_v7  ;;  %v1302_v47 = vld [vmem:[#allocation10 + $0x438] sm:$0xff] }
 0x1d5   :  { %1906 = vmatpush.msra.mxu2 %v1402_v8  ;;  %1883 = vmatpush.msra.mxu1 %v1338_v9  ;;  %v1366_v49 = vld [vmem:[#allocation10 + $0x638] sm:$0xff] }
 0x1d6   :  { %1769 = vmatpush.msrb.mxu0 %v1333_v16  ;;  %1838 = vmatpush.msrb.mxu3 %v1206_v17  ;;  %v1170_v52 = vld [vmem:[#allocation10 + $0x18] sm:$0xff] }
 0x1d7   :  { %1907 = vmatpush.msra.mxu2 %v1398_v10  ;;  %1884 = vmatpush.msra.mxu1 %v1334_v12  ;;  %v1294_v53 = vld [vmem:[#allocation10 + $0x3f8] sm:$0xff] }
 0x1d8   :  { %1770 = vmatpush.msrb.mxu0 %v1329_v13  ;;  %1839 = vmatpush.msrb.mxu3 %v1202_v14  ;;  %v1298_v54 = vld [vmem:[#allocation10 + $0x418] sm:$0xff] }
 0x1d9   :  { %1908 = vmatpush.msra.mxu2 %v1394_v15  ;;  %1885 = vmatpush.msra.mxu1 %v1330_v38  ;;  %v1362_v55 = vld [vmem:[#allocation10 + $0x618] sm:$0xff] }
 0x1da   :  { %1687 = vmatmul.f32.vlgmr.msra.gmra.mxu0 %v2373_v19  ;;  %1802 = vmatmul.f32.vlgmr.msrb.gmra.mxu1 %v2373_v19  ;;  %v1486_v56 = vld [vmem:[#allocation10 + $0x9f8] sm:$0xff] }
 0x1db   :  { %1771 = vmatpush.msrb.mxu0 %v1325_v39  ;;  %1840 = vmatpush.msrb.mxu3 %v1198_v18  ;;  %v1290_v57 = vld [vmem:[#allocation10 + $0x3d8] sm:$0xff] }
 0x1dc   :  { %1886 = vmatpush.msra.mxu1 %v1326_v42  ;;  %1909 = vmatpush.msra.mxu2 %v1390_v43  ;;  %v1482_v58 = vld [vmem:[#allocation10 + $0x9d8] sm:$0xff] }
 0x1dd   :  { %1772 = vmatpush.msrb.mxu0 %v1321_v20  ;;  %1841 = vmatpush.msrb.mxu3 %v1194_v21  ;;  %v1286_v59 = vld [vmem:[#allocation10 + $0x3b8] sm:$0xff] }
 0x1de   :  { %1887 = vmatpush.msra.mxu1 %v1322_v22  ;;  %1910 = vmatpush.msra.mxu2 %v1386_v23  ;;  %v1478_v60 = vld [vmem:[#allocation10 + $0x9b8] sm:$0xff]  ;;  %v1504_v22 = vpop.f32.mrf.mxu0 }
 0x1df   :  { %1773 = vmatpush.msrb.mxu0 %v1317_v24  ;;  %1842 = vmatpush.msrb.mxu3 %v1190_v26  ;;  %v1282_v61 = vld [vmem:[#allocation10 + $0x398] sm:$0xff] }
 0x1e0   :  { %1888 = vmatpush.msra.mxu1 %v1318_v62  ;;  %1911 = vmatpush.msra.mxu2 %v1382_v27  ;;  %v1474_v1 = vld [vmem:[#allocation10 + $0x998] sm:$0xff] }
 0x1e1   :  { %1774 = vmatpush.msrb.mxu0 %v1313_v28  ;;  %1843 = vmatpush.msrb.mxu3 %v1186_v29  ;;  %v1470_v4 = vld [vmem:[#allocation10 + $0x978] sm:$0xff]  ;;  %v2413_v28 = vld [vmem:[#allocation12] ss:$2 sm:$0xf] }
 0x1e2   :  { %1889 = vmatpush.msra.mxu1 %v1314_v31  ;;  %1912 = vmatpush.msra.mxu2 %v1378_v32  ;;  %v1274_v5 = vld [vmem:[#allocation10 + $0x358] sm:$0xff]  ;;  %v2415_v31 = vld [vmem:[#allocation12 + $0x1] ss:$2 sm:$0xf] }
 0x1e3   :  { %1690 = vmatmul.f32.gmra.mxu0 %v2377_v51  ;;  %1805 = vmatmul.f32.gmra.mxu1 %v2377_v51  ;;  %v1466_v6 = vld [vmem:[#allocation10 + $0x958] sm:$0xff] }
 0x1e4   :  { %1775 = vmatpush.msrb.mxu0 %v1309_v35  ;;  %1844 = vmatpush.msrb.mxu3 %v1182_v33  ;;  %v1266_v7 = vld [vmem:[#allocation10 + $0x318] sm:$0xff] }
 0x1e5   :  { %1890 = vmatpush.msra.mxu1 %v1310_v34  ;;  %1913 = vmatpush.msra.mxu2 %v1374_v36  ;;  %v1458_v8 = vld [vmem:[#allocation10 + $0x918] sm:$0xff]  ;;  %v1968_v34 = vperm.slane %v2415_v31, 0 }
 0x1e6   :  { %1776 = vmatpush.msrb.mxu0 %v1305_v37  ;;  %1845 = vmatpush.msrb.mxu3 %v1178_v40  ;;  %v1262_v9 = vld [vmem:[#allocation10 + $0x2f8] sm:$0xff]  ;;  %v1507_v62 = vpop.f32.mrf.mxu0 }
 0x1e7   :  { %1891 = vmatpush.msra.mxu1 %v1306_v41  ;;  %1914 = vmatpush.msra.mxu2 %v1370_v44  ;;  %v1258_v16 = vld [vmem:[#allocation10 + $0x2d8] sm:$0xff] }
 0x1e8   :  { %1777 = vmatpush.msrb.mxu0 %v1301_v45  ;;  %1846 = vmatpush.msrb.mxu3 %v1174_v46  ;;  %v1450_v17 = vld [vmem:[#allocation10 + $0x8d8] sm:$0xff] }
 0x1e9   :  { %1892 = vmatpush.msra.mxu1 %v1302_v47  ;;  %1915 = vmatpush.msra.mxu2 %v1366_v49  ;;  %v1254_v10 = vld [vmem:[#allocation10 + $0x2b8] sm:$0xff] }
 0x1ea   :  { %1778 = vmatpush.msrb.mxu0 %v1297_v50  ;;  %1847 = vmatpush.msrb.mxu3 %v1170_v52  ;;  %v1442_v12 = vld [vmem:[#allocation10 + $0x898] sm:$0xff]  ;;  %v1527_v20 = vpop.f32.mrf.mxu1 }
 0x1eb   :  { %1848 = vmatmul.f32.vlgmr.msrb.gmra.mxu3 %v2337_v11  ;;  %1893 = vmatpush.msra.mxu1 %v1298_v54  ;;  %v1278_v11 = vld [vmem:[#allocation10 + $0x378] sm:$0xff]  ;;  %v1528_v27 = vadd.f32 %v1527_v20, %v1504_v22 }
 0x1ec   :  { %1855 = vmatpush.msra.mxu0 %v1294_v53  ;;  %1916 = vmatpush.msra.mxu2 %v1362_v55  ;;  %v1246_v13 = vld [vmem:[#allocation10 + $0x278] sm:$0xff] }
 0x1ed   :  { %1924 = vmatpush.msra.mxu3 %v1486_v56  ;;  %1779 = vmatmul.f32.vlgmr.msrb.gmra.mxu0 %v2362_v3  ;;  %v1438_v14 = vld [vmem:[#allocation10 + $0x878] sm:$0xff] }
 0x1ee   :  { %1894 = vmatmul.f32.vlgmr.msra.gmra.mxu1 %v2362_v3  ;;  %1917 = vmatmul.f32.vlgmr.msra.gmra.mxu2 %v2373_v19  ;;  %v1270_v3 = vld [vmem:[#allocation10 + $0x338] sm:$0xff] }
 0x1ef   :  { %1856 = vmatpush.msra.mxu0 %v1290_v57  ;;  %1925 = vmatpush.msra.mxu3 %v1482_v58  ;;  %v1462_v19 = vld [vmem:[#allocation10 + $0x938] sm:$0xff] }
 0x1f0   :  { %v1242_v15 = vld [vmem:[#allocation10 + $0x258] sm:$0xff] }
 0x1f1   :  { %1857 = vmatpush.msra.mxu0 %v1286_v59  ;;  %1926 = vmatpush.msra.mxu3 %v1478_v60  ;;  %v1434_v38 = vld [vmem:[#allocation10 + $0x858] sm:$0xff]  ;;  %v1950_v59 = vperm.slane %v2413_v28, 1 }
 0x1f2   :  { %v1238_v39 = vld [vmem:[#allocation10 + $0x238] sm:$0xff] }
 0x1f3   :  { %1858 = vmatpush.msra.mxu0 %v1282_v61  ;;  %1927 = vmatpush.msra.mxu3 %v1474_v1  ;;  %v1430_v18 = vld [vmem:[#allocation10 + $0x838] sm:$0xff]  ;;  %v1969_v61 = vperm.slane %v2415_v31, 1 }
 0x1f4   :  { %1851 = vmatmul.f32.gmra.mxu3 %v2340_v30  ;;  %v1454_v30 = vld [vmem:[#allocation10 + $0x8f8] sm:$0xff]  ;;  %v1530_v23 = vpop.f32.mrf.mxu1 }
 0x1f5   :  { %1859 = vmatpush.msra.mxu0 %v1278_v11  ;;  %1928 = vmatpush.msra.mxu3 %v1470_v4  ;;  %v1234_v42 = vld [vmem:[#allocation10 + $0x218] sm:$0xff]  ;;  %v1531_v36 = vadd.f32 %v1530_v23, %v1507_v62 }
 0x1f6   :  { %1782 = vmatmul.f32.gmra.mxu0 %v2366_v25  ;;  %1897 = vmatmul.f32.gmra.mxu1 %v2366_v25  ;;  %v1446_v25 = vld [vmem:[#allocation10 + $0x8b8] sm:$0xff] }
 0x1f7   :  { %1920 = vmatmul.f32.gmra.mxu2 %v2377_v51  ;;  %1860 = vmatpush.msra.mxu0 %v1274_v5  ;;  %v1250_v51 = vld [vmem:[#allocation10 + $0x298] sm:$0xff] }
 0x1f8   :  { %1929 = vmatpush.msra.mxu3 %v1466_v6  ;;  %v1426_v43 = vld [vmem:[#allocation10 + $0x818] sm:$0xff] }
 0x1f9   :  { %1861 = vmatpush.msra.mxu0 %v1270_v3 }
 0x1fa   :  { %1930 = vmatpush.msra.mxu3 %v1462_v19 }
 0x1fb   :  { %1862 = vmatpush.msra.mxu0 %v1266_v7 }
 0x1fc   :  { %1931 = vmatpush.msra.mxu3 %v1458_v8 }
 0x1fd   :  { %1863 = vmatpush.msra.mxu0 %v1262_v9 }
 0x1fe   :  { %1932 = vmatpush.msra.mxu3 %v1454_v30 }
 0x1ff   :  { %1864 = vmatpush.msra.mxu0 %v1258_v16 }
 0x200   :  { %1933 = vmatpush.msra.mxu3 %v1450_v17 }
 0x201   :  { %1865 = vmatpush.msra.mxu0 %v1254_v10 }
 0x202   :  { %1934 = vmatpush.msra.mxu3 %v1446_v25 }
 0x203   :  { %1866 = vmatpush.msra.mxu0 %v1250_v51 }
 0x204   :  { %1935 = vmatpush.msra.mxu3 %v1442_v12 }
 0x205   :  { %1867 = vmatpush.msra.mxu0 %v1246_v13 }
 0x206   :  { %1936 = vmatpush.msra.mxu3 %v1438_v14  ;;  %v1550_v21 = vpop.f32.mrf.mxu2 }
 0x207   :  { %1868 = vmatpush.msra.mxu0 %v1242_v15  ;;  %v1551_v29 = vadd.f32 %v1550_v21, %v1528_v27 }
 0x208   :  { %1937 = vmatpush.msra.mxu3 %v1434_v38  ;;  %v1951_v38 = vperm.slane %v2413_v28, 2 }
 0x209   :  { %1869 = vmatpush.msra.mxu0 %v1238_v39 }
 0x20a   :  { %1938 = vmatpush.msra.mxu3 %v1430_v18 }
 0x20b   :  { %1870 = vmatpush.msra.mxu0 %v1234_v42  ;;  %v1970_v42 = vperm.slane %v2415_v31, 2 }
 0x20c   :  { %1939 = vmatpush.msra.mxu3 %v1426_v43  ;;  %1871 = vmatmul.f32.vlgmr.msra.gmra.mxu0 %v2349_v2  ;;  %v1619_v2 = vpop.f32.mrf.mxu1 }
 0x20d   :  { %1940 = vmatmul.f32.vlgmr.msra.gmra.mxu3 %v2385_v48  ;;  %v1949_v48 = vperm.slane %v2413_v28, 0 }
 0x210   :  { %v1553_v24 = vpop.f32.mrf.mxu2 }
 0x211   :  { %v1554_v40 = vadd.f32 %v1553_v24, %v1531_v36 }
 0x214   :  { %1874 = vmatmul.f32.gmra.mxu0 %v2356_v63  ;;  %v1622_v46 = vpop.f32.mrf.mxu1 }
 0x215   :  { %1943 = vmatmul.f32.gmra.mxu3 %v2391_v0 }
 0x218   :  { %v1642_v35 = vpop.f32.mrf.mxu2 }
 0x219   :  { %v1643_v54 = vadd.f32 %v1642_v35, %v1619_v2 }
 0x220   :  { %v1645_v49 = vpop.f32.mrf.mxu2 }
 0x221   :  { %v1646_v5 = vadd.f32 %v1645_v49, %v1622_v46 }
 0x228   :  { %v1573_v26 = vpop.f32.mrf.mxu3  ;;  %v1734_v1 = vpop.f32.mrf.mxu2 }
 0x229   :  { %v1574_v32 = vadd.f32 %v1573_v26, %v1551_v29 }
 0x230   :  { %v1737_v30 = vpop.f32.mrf.mxu2 }
 0x232   :  { %v1576_v0 = vpop.f32.mrf.mxu3 }
 0x233   :  { %v1577_v44 = vadd.f32 %v1576_v0, %v1554_v40 }
 0x23a   :  { %v1665_v50 = vpop.f32.mrf.mxu3 }
 0x23b   :  { %v1666_v55 = vadd.f32 %v1665_v50, %v1643_v54 }
 0x242   :  { %v1668_v11 = vpop.f32.mrf.mxu3 }
 0x243   :  { %v1669_v3 = vadd.f32 %v1668_v11, %v1646_v5 }
 0x245   :  { %v1596_v63 = vpop.f32.mrf.mxu0 }
 0x246   :  { %v1597_v33 = vadd.f32 %v1596_v63, %v1574_v32  ;;  %v1711_v56 = vpop.f32.mrf.mxu1 }
 0x248   :  { %v1957_v37 = vmul.f32 %v1949_v48, %v1597_v33 }
 0x24a   :  { %v1976_v41 = vadd.f32 %v1968_v34, %v1957_v37  ;;  %v1757_v16 = vpop.f32.mrf.mxu3  ;;  %v1952_v37 = vperm.slane %v2413_v28, 3 }
 0x24b   :  { %v1758_v25 = vadd.f32 %v1757_v16, %v1734_v1 }
 0x24c   :  { %1984 = vst [vmem:[%s2456_s7] sm:$0xff] %v1976_v41 }
 0x24d   :  { %v1826_v14 = vpop.f32.mrf.mxu2 }
 0x24e   :  { %v1599_v45 = vpop.f32.mrf.mxu0  ;;  %v1714_v7 = vpop.f32.mrf.mxu1 }
 0x24f   :  { %v1600_v47 = vadd.f32 %v1599_v45, %v1577_v44  ;;  %v1971_v44 = vperm.slane %v2415_v31, 3 }
 0x251   :  { %v1961_v52 = vmul.f32 %v1949_v48, %v1600_v47 }
 0x253   :  { %v1980_v53 = vadd.f32 %v1968_v34, %v1961_v52  ;;  %v1760_v39 = vpop.f32.mrf.mxu3 }
 0x254   :  { %v1761_v43 = vadd.f32 %v1760_v39, %v1737_v30 }
 0x255   :  { %1988 = vst [vmem:[%s2456_s7 + $0x20] sm:$0xff] %v1980_v53 }
 0x256   :  { %v1829_v62 = vpop.f32.mrf.mxu2 }
 0x257   :  { %v1688_v57 = vpop.f32.mrf.mxu0  ;;  %v1803_v51 = vpop.f32.mrf.mxu1 }
 0x258   :  { %v1689_v58 = vadd.f32 %v1688_v57, %v1666_v55 }
 0x25a   :  { %v1712_v60 = vadd.f32 %v1711_v56, %v1689_v58 }
 0x25c   :  { %v1958_v4 = vmul.f32 %v1950_v59, %v1712_v60 }
 0x25e   :  { %v1977_v6 = vadd.f32 %v1969_v61, %v1958_v4 }
 0x260   :  { %1985 = vst [vmem:[%s2456_s7 + $0x8] sm:$0xff] %v1977_v6  ;;  %v1691_v19 = vpop.f32.mrf.mxu0  ;;  %v1806_v24 = vpop.f32.mrf.mxu1 }
 0x261   :  { %v1692_v8 = vadd.f32 %v1691_v19, %v1669_v3 }
 0x263   :  { %v1715_v9 = vadd.f32 %v1714_v7, %v1692_v8 }
 0x265   :  { %v1962_v17 = vmul.f32 %v1950_v59, %v1715_v9 }
 0x267   :  { %v1981_v10 = vadd.f32 %v1969_v61, %v1962_v17 }
 0x269   :  { %1989 = vst [vmem:[%s2456_s7 + $0x28] sm:$0xff] %v1981_v10 }
 0x26a   :  { %v1780_v12 = vpop.f32.mrf.mxu0 }
 0x26b   :  { %v1781_v13 = vadd.f32 %v1780_v12, %v1758_v25  ;;  %v1895_v63 = vpop.f32.mrf.mxu1 }
 0x26d   :  { %v1804_v15 = vadd.f32 %v1803_v51, %v1781_v13 }
 0x26e   :  { %v1849_v32 = vpop.f32.mrf.mxu3 }
 0x26f   :  { %v1827_v18 = vadd.f32 %v1826_v14, %v1804_v15 }
 0x271   :  { %v1959_v20 = vmul.f32 %v1951_v38, %v1827_v18  ;;  %v1918_v33 = vpop.f32.mrf.mxu2 }
 0x273   :  { %v1783_v21 = vpop.f32.mrf.mxu0  ;;  %v1978_v22 = vadd.f32 %v1970_v42, %v1959_v20  ;;  %v1898_v49 = vpop.f32.mrf.mxu1 }
 0x274   :  { %v1784_v23 = vadd.f32 %v1783_v21, %v1761_v43 }
 0x275   :  { %1986 = vst [vmem:[%s2456_s7 + $0x10] sm:$0xff] %v1978_v22 }
 0x276   :  { %v1807_v26 = vadd.f32 %v1806_v24, %v1784_v23 }
 0x277   :  { %v1852_v48 = vpop.f32.mrf.mxu3 }
 0x278   :  { %v1830_v27 = vadd.f32 %v1829_v62, %v1807_v26 }
 0x27a   :  { %v1963_v29 = vmul.f32 %v1951_v38, %v1830_v27  ;;  %v1921_v53 = vpop.f32.mrf.mxu2 }
 0x27c   :  { %v1982_v2 = vadd.f32 %v1970_v42, %v1963_v29 }
 0x27e   :  { %1990 = vst [vmem:[%s2456_s7 + $0x30] sm:$0xff] %v1982_v2 }
 0x289   :  { %v1872_v35 = vpop.f32.mrf.mxu0 }
 0x28a   :  { %v1873_v0 = vadd.f32 %v1872_v35, %v1849_v32 }
 0x28c   :  { %v1896_v34 = vadd.f32 %v1895_v63, %v1873_v0 }
 0x28e   :  { %v1919_v36 = vadd.f32 %v1918_v33, %v1896_v34 }
 0x290   :  { %v1941_v40 = vpop.f32.mrf.mxu3 }
 0x291   :  { %v1942_v41 = vadd.f32 %v1941_v40, %v1919_v36  ;;  %v1875_v45 = vpop.f32.mrf.mxu0 }
 0x292   :  { %v1876_v47 = vadd.f32 %v1875_v45, %v1852_v48 }
 0x293   :  { %v1960_v46 = vmul.f32 %v1952_v37, %v1942_v41 }
 0x294   :  { %v1899_v52 = vadd.f32 %v1898_v49, %v1876_v47 }
 0x295   :  { %v1979_v50 = vadd.f32 %v1971_v44, %v1960_v46 }
 0x296   :  { %v1922_v54 = vadd.f32 %v1921_v53, %v1899_v52 }
 0x297   :  { %1987 = vst [vmem:[%s2456_s7 + $0x18] sm:$0xff] %v1979_v50 }
 0x298   :  { %v1944_v55 = vpop.f32.mrf.mxu3 }
 0x299   :  { %v1945_v56 = vadd.f32 %v1944_v55, %v1922_v54 }
 0x29b   :  { %v1964_v57 = vmul.f32 %v1952_v37, %v1945_v56 }
 0x29d   :  { %v1983_v28 = vadd.f32 %v1971_v44, %v1964_v57 }
 0x29f   :  { %1991 = vst [vmem:[%s2456_s7 + $0x38] sm:$0xff] %v1983_v28 }
 0x2a0   :  { %1996 = vsyncpa [#allocation3], 1 }
 0x2a1   :  { %1997 = vsyncpa [#allocation5], 1 }
 0x2a2   :  { %1998 = vsyncpa [#allocation8], 1 }
 0x2a3   :  { %1999 = vsyncpa [#allocation11], 1 }

</bundles_post_ra>
